<compile_context>
chip_gen: v5e
topology: v5e:2x2
jax: 0.10.0
libtpu: 0.0.40
codegen_flags: <defaults>
</compile_context>

<pallas_src>
import functools

import jax
import jax.numpy as jnp
from jax.experimental import pallas as pl
from jax.experimental.pallas import tpu as pltpu


def _pick_tile(n, target, mult=1):
    """Largest multiple-of-`mult` divisor of n that is <= target (else n)."""
    if n <= target:
        return n
    t = (target // mult) * mult
    while t >= mult:
        if n % t == 0:
            return t
        t -= mult
    # TODO(synk): pad to a multiple of `mult` and mask instead of the
    # full-extent fallback when n has no suitable divisor (e.g. prime L).
    return n


def _vmem_limit(footprint_bytes):
    """Scoped-VMEM limit from the real block footprint (16 MiB..40 MiB)."""
    return int(min(40 * 1024 * 1024, max(16 * 1024 * 1024, 2 * footprint_bytes)))


# ----------------------------------------------------------------------------
# Fused single-pass kernel: one batch element fully resident per grid step.
# ----------------------------------------------------------------------------
def _se_fused_kernel(x_ref, w1_ref, w2_ref, o_ref, *, inv_len):
    # x_ref/o_ref: (1, C, L)  -- one batch element, fully resident in VMEM.
    # w1_ref:      (H, C)     == nn.Linear(C -> H).weight (untransposed)
    # w2_ref:      (C, H)     == nn.Linear(H -> C).weight (untransposed)
    x = x_ref[...].astype(jnp.float32)                                # (1, C, L)
    y = jnp.sum(x, axis=-1) * inv_len                                 # (1, C) mean over L
    w1 = w1_ref[...].astype(jnp.float32)                              # (H, C)
    w2 = w2_ref[...].astype(jnp.float32)                              # (C, H)
    # Excite MLP on the VPU (shapes far too small for the MXU).
    h = jnp.maximum(jnp.sum(y[:, None, :] * w1[None, :, :], axis=-1), 0.0)   # (1, H)
    s = jax.nn.sigmoid(jnp.sum(h[:, None, :] * w2[None, :, :], axis=-1))     # (1, C)
    o_ref[...] = (x * s[:, :, None]).astype(o_ref.dtype)              # f32 multiply, cast at store


def _se_fused(x, w1, w2):
    B, C, L = x.shape
    H = w1.shape[0]
    footprint = 4 * C * L * x.dtype.itemsize + (2 * H * C * w1.dtype.itemsize)
    return pl.pallas_call(
        functools.partial(_se_fused_kernel, inv_len=1.0 / float(L)),
        out_shape=jax.ShapeDtypeStruct((B, C, L), x.dtype),
        grid_spec=pltpu.PrefetchScalarGridSpec(
            num_scalar_prefetch=0,
            grid=(B,),
            in_specs=[
                pl.BlockSpec((1, C, L), lambda b: (b, 0, 0)),
                pl.BlockSpec((H, C), lambda b: (0, 0)),
                pl.BlockSpec((C, H), lambda b: (0, 0)),
            ],
            out_specs=pl.BlockSpec((1, C, L), lambda b: (b, 0, 0)),
        ),
        compiler_params=pltpu.CompilerParams(
            dimension_semantics=("parallel",),       # independent per batch; v7x dual-TC
            vmem_limit_bytes=_vmem_limit(footprint),
        ),
    )(x, w1, w2)


# ----------------------------------------------------------------------------
# Two-pass fallback for large C*L.
# Pass 1: mean over L + excite MLP -> gate (B, 1, C) in f32.
# ----------------------------------------------------------------------------
def _se_gate_kernel(x_ref, w1_ref, w2_ref, gate_ref, acc_ref, *, inv_len):
    # x_ref:    (1, C, tl)  tile of one batch element; grid = (B, L tiles).
    # gate_ref: (1, 1, C)   f32 gate for this batch element.
    # acc_ref:  (1, C)      f32 partial-sum accumulator (per-core scratch).
    j = pl.program_id(1)

    @pl.when(j == 0)
    def _init():
        acc_ref[...] = jnp.zeros_like(acc_ref)

    acc_ref[...] += jnp.sum(x_ref[...].astype(jnp.float32), axis=-1)   # (1, C)

    @pl.when(j == pl.num_programs(1) - 1)
    def _finalize():
        y = acc_ref[...] * inv_len                                     # true mean over L
        w1 = w1_ref[...].astype(jnp.float32)                           # (H, C)
        w2 = w2_ref[...].astype(jnp.float32)                           # (C, H)
        h = jnp.maximum(jnp.sum(y[:, None, :] * w1[None, :, :], axis=-1), 0.0)   # (1, H)
        s = jax.nn.sigmoid(jnp.sum(h[:, None, :] * w2[None, :, :], axis=-1))     # (1, C)
        gate_ref[...] = s[:, None, :]                                  # (1, 1, C)


# Pass 2: scale on the transpose-free (B*C, L) view; gate is a lane-broadcast
# column, L stays the lane axis so every store is a full-lane vst for L>=128.
def _se_scale_kernel(x_ref, gate_ref, o_ref):
    # x_ref/o_ref: (tbc, tl) tiles of the (B*C, L) view; gate_ref: (tbc, 1) f32.
    g = gate_ref[...]
    o_ref[...] = (x_ref[...].astype(jnp.float32) * g).astype(o_ref.dtype)


def _se_two_pass(x, w1, w2):
    B, C, L = x.shape
    H = w1.shape[0]
    BC = B * C
    itemsize = x.dtype.itemsize

    # ---------------- pass 1: gate ----------------
    tl_g = _pick_tile(L, 2048, mult=128)       # big L tiles: pure HBM-bandwidth reduction
    gate = pl.pallas_call(
        functools.partial(_se_gate_kernel, inv_len=1.0 / float(L)),
        out_shape=jax.ShapeDtypeStruct((B, 1, C), jnp.float32),
        grid_spec=pltpu.PrefetchScalarGridSpec(
            num_scalar_prefetch=0,
            grid=(B, L // tl_g),
            in_specs=[
                pl.BlockSpec((1, C, tl_g), lambda b, j: (b, 0, j)),
                pl.BlockSpec((H, C), lambda b, j: (0, 0)),
                pl.BlockSpec((C, H), lambda b, j: (0, 0)),
            ],
            out_specs=pl.BlockSpec((1, 1, C), lambda b, j: (b, 0, 0)),
            scratch_shapes=[pltpu.VMEM((1, C), jnp.float32)],
        ),
        compiler_params=pltpu.CompilerParams(
            dimension_semantics=("parallel", "arbitrary"),   # B parallel (v7x), L reduction
            vmem_limit_bytes=_vmem_limit(4 * C * tl_g * itemsize),
        ),
    )(x, w1, w2)

    # Tiny (<= a few KiB) relayout of the gate into its consumer layout.
    gate_col = gate.reshape(BC, 1)

    # ---------------- pass 2: scale on the (B*C, L) view ----------------
    x_bcl = x.reshape(BC, L)                   # transpose-free view of x
    tbc = _pick_tile(BC, 512, mult=8)
    tl_s = _pick_tile(L, 2048, mult=128)
    out = pl.pallas_call(
        _se_scale_kernel,
        out_shape=jax.ShapeDtypeStruct((BC, L), x.dtype),
        grid_spec=pltpu.PrefetchScalarGridSpec(
            num_scalar_prefetch=0,
            grid=(BC // tbc, L // tl_s),
            in_specs=[
                pl.BlockSpec((tbc, tl_s), lambda i, j: (i, j)),
                pl.BlockSpec((tbc, 1), lambda i, j: (i, 0)),
            ],
            out_specs=pl.BlockSpec((tbc, tl_s), lambda i, j: (i, j)),
        ),
        compiler_params=pltpu.CompilerParams(
            dimension_semantics=("parallel", "parallel"),
            vmem_limit_bytes=_vmem_limit(4 * tbc * tl_s * itemsize),
        ),
    )(x_bcl, gate_col)

    return out.reshape(B, C, L)


def se_layer(x, w1, w2):
    """SELayer forward.  x: (B, C, L); w1: (H, C); w2: (C, H)."""
    _, C, L = x.shape
    per_batch_bytes = C * L * x.dtype.itemsize
    # Fused single pass whenever one (C, L) slice + its output (double-buffered)
    # comfortably fits VMEM on every generation (v7x: 64 MiB per TC).
    if per_batch_bytes <= 4 * 1024 * 1024:
        return _se_fused(x, w1, w2)
    return _se_two_pass(x, w1, w2)


def se_layer_ref(x, w1, w2):
    """Pure-JAX reference mirroring the PyTorch forward."""
    y = jnp.mean(x, axis=-1)                    # (B, C)
    y = jnp.maximum(y @ w1.T, 0.0)              # (B, H)
    y = jax.nn.sigmoid(y @ w2.T)                # (B, C)
    return x * y[:, :, None]


if __name__ == "__main__":
    # Module config: channel=64, reduction=16 -> hidden H = 4.
    B, C, L = 2, 64, 16
    reduction = 16
    H = C // reduction

    key = jax.random.PRNGKey(0)
    kx, k1, k2 = jax.random.split(key, 3)

    x = jax.random.normal(kx, (B, C, L), dtype=jnp.float32)
    w1 = jax.random.normal(k1, (H, C), dtype=jnp.float32) * 0.1   # Linear(C -> H) weight
    w2 = jax.random.normal(k2, (C, H), dtype=jnp.float32) * 0.1   # Linear(H -> C) weight

    # Fused single-pass path (the one this problem size exercises).
    out = jax.jit(se_layer)(x, w1, w2)
    jax.block_until_ready(out)
    ref = se_layer_ref(x, w1, w2)
    assert out.shape == (B, C, L)
    assert jnp.allclose(out, ref, atol=1e-5, rtol=1e-5), "fused path mismatch vs reference"

    # Also exercise the large-L two-pass fallback once for coverage.
    L2 = 1024
    x2 = jax.random.normal(jax.random.PRNGKey(1), (B, C, L2), dtype=jnp.float32)
    out2 = jax.block_until_ready(jax.jit(_se_two_pass)(x2, w1, w2))
    ref2 = se_layer_ref(x2, w1, w2)
    assert jnp.allclose(out2, ref2, atol=1e-5, rtol=1e-5), "two-pass path mismatch vs reference"

    print("KERNEL_OK")
</pallas_src>

<mosaic_0001>
module attributes {stable_mosaic.version = 11 : i64} {
  func.func @_se_fused_kernel(%arg0: i32, %arg1: memref<1x64x16xf32, #tpu.memory_space<vmem>>, %arg2: memref<4x64xf32, #tpu.memory_space<vmem>>, %arg3: memref<64x4xf32, #tpu.memory_space<vmem>>, %arg4: memref<1x64x16xf32, #tpu.memory_space<vmem>>) attributes {dimension_semantics = [#tpu.dimension_semantics<parallel>], iteration_bounds = array<i64: 2>, scalar_prefetch = 0 : i64, scratch_operands = 0 : i64, tpu.core_type = #tpu.core_type<tc>, window_params = [{transform_indices = @transform_0, window_bounds = array<i64: 1, 64, 16>}, {pipeline_mode = #tpu.pipeline_mode<synchronous>, transform_indices = @transform_1, window_bounds = array<i64: 4, 64>}, {pipeline_mode = #tpu.pipeline_mode<synchronous>, transform_indices = @transform_2, window_bounds = array<i64: 64, 4>}, {transform_indices = @transform_3, window_bounds = array<i64: 1, 64, 16>}]} {
    %c0 = arith.constant 0 : index
    %c0_0 = arith.constant 0 : index
    %c0_1 = arith.constant 0 : index
    %0 = vector.load %arg1[%c0, %c0_0, %c0_1] : memref<1x64x16xf32, #tpu.memory_space<vmem>>, vector<1x64x16xf32>
    %cst = arith.constant dense<0.000000e+00> : vector<1x64xf32>
    %1 = vector.multi_reduction <add>, %0, %cst [2] : vector<1x64x16xf32> to vector<1x64xf32>
    %cst_2 = arith.constant 6.250000e-02 : f32
    %2 = vector.broadcast %cst_2 : f32 to vector<1x64xf32>
    %3 = arith.mulf %1, %2 : vector<1x64xf32>
    %c0_3 = arith.constant 0 : index
    %c0_4 = arith.constant 0 : index
    %4 = vector.load %arg2[%c0_3, %c0_4] : memref<4x64xf32, #tpu.memory_space<vmem>>, vector<4x64xf32>
    %c0_5 = arith.constant 0 : index
    %c0_6 = arith.constant 0 : index
    %5 = vector.load %arg3[%c0_5, %c0_6] : memref<64x4xf32, #tpu.memory_space<vmem>>, vector<64x4xf32>
    %6 = vector.shape_cast %3 : vector<1x64xf32> to vector<1x1x64xf32>
    %7 = vector.shape_cast %4 : vector<4x64xf32> to vector<1x4x64xf32>
    %8 = vector.broadcast %6 : vector<1x1x64xf32> to vector<1x4x64xf32>
    %9 = arith.mulf %8, %7 : vector<1x4x64xf32>
    %cst_7 = arith.constant dense<0.000000e+00> : vector<1x4xf32>
    %10 = vector.multi_reduction <add>, %9, %cst_7 [2] : vector<1x4x64xf32> to vector<1x4xf32>
    %cst_8 = arith.constant 0.000000e+00 : f32
    %11 = vector.broadcast %cst_8 : f32 to vector<1x4xf32>
    %12 = arith.maximumf %10, %11 : vector<1x4xf32>
    %13 = vector.shape_cast %12 : vector<1x4xf32> to vector<1x1x4xf32>
    %14 = vector.shape_cast %5 : vector<64x4xf32> to vector<1x64x4xf32>
    %15 = vector.broadcast %13 : vector<1x1x4xf32> to vector<1x64x4xf32>
    %16 = arith.mulf %15, %14 : vector<1x64x4xf32>
    %cst_9 = arith.constant dense<0.000000e+00> : vector<1x64xf32>
    %17 = vector.multi_reduction <add>, %16, %cst_9 [2] : vector<1x64x4xf32> to vector<1x64xf32>
    %18 = arith.negf %17 : vector<1x64xf32>
    %19 = math.exp %18 : vector<1x64xf32>
    %cst_10 = arith.constant 1.000000e+00 : f32
    %20 = vector.broadcast %cst_10 : f32 to vector<1x64xf32>
    %21 = arith.addf %20, %19 : vector<1x64xf32>
    %22 = arith.divf %20, %21 : vector<1x64xf32>
    %23 = vector.shape_cast %22 : vector<1x64xf32> to vector<1x64x1xf32>
    %24 = vector.broadcast %23 : vector<1x64x1xf32> to vector<1x64x16xf32>
    %25 = arith.mulf %0, %24 : vector<1x64x16xf32>
    %c0_11 = arith.constant 0 : index
    %c0_12 = arith.constant 0 : index
    %c0_13 = arith.constant 0 : index
    %26 = vector.load %arg4[%c0_11, %c0_12, %c0_13] : memref<1x64x16xf32, #tpu.memory_space<vmem>>, vector<1x64x16xf32>
    tpu.vector_store %arg4[%c0_11, %c0_12, %c0_13], %25 {strides = array<i32>} : memref<1x64x16xf32, #tpu.memory_space<vmem>>, vector<1x64x16xf32>,
    return
  }
  func.func @transform_0(%arg0: i32) -> (i32, i32, i32) {
    %c0_i32 = arith.constant 0 : i32
    %c0_i32_0 = arith.constant 0 : i32
    %c0_i32_1 = arith.constant 0 : i32
    return %arg0, %c0_i32, %c0_i32_0 : i32, i32, i32
  }
  func.func @transform_1(%arg0: i32) -> (i32, i32) {
    %c0_i32 = arith.constant 0 : i32
    %c0_i32_0 = arith.constant 0 : i32
    %c0_i32_1 = arith.constant 0 : i32
    return %c0_i32, %c0_i32_0 : i32, i32
  }
  func.func @transform_2(%arg0: i32) -> (i32, i32) {
    %c0_i32 = arith.constant 0 : i32
    %c0_i32_0 = arith.constant 0 : i32
    %c0_i32_1 = arith.constant 0 : i32
    return %c0_i32, %c0_i32_0 : i32, i32
  }
  func.func @transform_3(%arg0: i32) -> (i32, i32, i32) {
    %c0_i32 = arith.constant 0 : i32
    %c0_i32_0 = arith.constant 0 : i32
    %c0_i32_1 = arith.constant 0 : i32
    return %arg0, %c0_i32, %c0_i32_0 : i32, i32, i32
  }
}

</mosaic_0001>

<bundles_post_ra>
// kernel: se_layer.1
= control target key start
LH: loop header
LB: loop body
LE: loop exit
PB: predicated region body
PF: predicated region fallthrough
CT: control target
= control target key end

     0   :  { %s2058_s12 = smov 0   ;;  %s2858_s0 = inlined_call_operand.vmem [shape: f32[2,64,16], index: 0, kind: input, shape index: {}]   ;;  %s2859_s1 = inlined_call_operand.vmem [shape: f32[4,64], index: 1, kind: input, shape index: {}]   ;;  %s2860_s2 = inlined_call_operand.vmem [shape: f32[64,4], index: 2, kind: input, shape index: {}]   ;;  %s2861_s3 = inlined_call_operand.vmem [shape: f32[2,64,16], index: 3, kind: output, shape index: {}]  }
   0x1 LB: > { %s1918_s13 = sadd.s32 4294967295, %s2035_s12   ;;  %p1922_p0 = scmp.ge.s32.totalorder %s2035_s12, 1  ;;  %s2035_s12 = sphi %s2058_s12, %s13_s12  }
   0x2   : > { %p137_p1 = scmp.lt.s32.totalorder %s2035_s12, 3 }
   0x4   : > { %p138_p2 = pnand %p1922_p0, %p137_p1 }
   0x5   : > { %p161_p3 = scmp.lt.s32.totalorder (!%p138_p2), %s1918_s13, 1 }
   0x6   : > { %141 = sbr.rel (%p138_p2) target bundleno = 1067 (0x42b), region = 32 }
   0xb   : > { %v223_v0 = vlaneseq  ;;  %s2863_s13 = smov (!%p161_p3, %s1918_s13), 1  ;;  %vm179_vm0 = vcmask 130048   ;;  %v212_v20 = vld [vmem:[%s2859_s1] sm:$0xf]  ;;  %v2037_v36 = vmov 0   ;;  %vm615_vm1 = vcmask 130112  }
   0xc   : > { %s1937_s14 = sshll.u32 %s2863_s13, 6  ;;  %v222_v21 = vperm.slane %v212_v20, 0  ;;  %v271_v24 = vperm.slane %v212_v20, 1  ;;  %v320_v28 = vperm.slane %v212_v20, 2  ;;  %v2132_v29 = vperm.slane %v212_v20, 3 }
   0xd   : > { %v2069_v1 = vshrl.u32 %v223_v0, 7  ;;  %s2081_s17 = scalar_lea.vmem %s2858_s0, %s1937_s14  ;;  %vm619_vm2 = vcmask 195712   ;;  %vm623_vm3 = vcmask 261312   ;;  %vm627_vm4 = vcmask 326912   ;;  %s2829_s11 = scalar_lea.vmem %s2861_s3, %s1937_s14 }
   0xe   : > { %v175_v3 = vld [vmem:[%s2081_s17 + $0x20] sm:$0xff]  ;;  %v173_v4 = vld [vmem:[%s2081_s17 + $0x10] sm:$0xff]  ;;  %v176_v10 = vld [vmem:[%s2081_s17 + $0x28] sm:$0xff]  ;;  %vm631_vm5 = vcmask 392512   ;;  %vm635_vm6 = vcmask 458112   ;;  %vm639_vm7 = vcmask 523712  }
   0xf   : > { %1948 = vset.pattern.permute.xlu2 %v2069_v1  ;;  %v2074_v2 = vadd.s32 8, %v2069_v1  ;;  %v171_v5 = vld [vmem:[%s2081_s17] sm:$0xff]  ;;  %v192_v6 = vsel %vm179_vm0, %v175_v3, 0.0  ;;  %v186_v7 = vsel %vm179_vm0, %v173_v4, 0.0  ;;  %v2091_v9 = vadd.s32 16, %v2069_v1  ;;  %v174_v11 = vld [vmem:[%s2081_s17 + $0x18] sm:$0xff] }
  0x10   : > { %v180_v8 = vsel %vm179_vm0, %v171_v5, 0.0  ;;  %193 = vadd.xlane.f32.xlu2 %v192_v6  ;;  %187 = vadd.xlane.f32.xlu1 %v186_v7  ;;  %v172_v12 = vld [vmem:[%s2081_s17 + $0x8] sm:$0xff]  ;;  %v195_v13 = vsel %vm179_vm0, %v176_v10, 0.0  ;;  %v189_v14 = vsel %vm179_vm0, %v174_v11, 0.0  ;;  %v178_v16 = vld [vmem:[%s2081_s17 + $0x38] sm:$0xff]  ;;  %v177_v17 = vld [vmem:[%s2081_s17 + $0x30] sm:$0xff] }
  0x11   : > { %1949 = vset.pattern.permute.xlu0 %v2074_v2  ;;  %1950 = vset.pattern.permute.xlu1 %v2091_v9  ;;  %v183_v15 = vsel %vm179_vm0, %v172_v12, 0.0  ;;  %v201_v18 = vsel %vm179_vm0, %v178_v16, 0.0  ;;  %v198_v19 = vsel %vm179_vm0, %v177_v17, 0.0  ;;  %v2108_v22 = vadd.s32 24, %v2069_v1 }
  0x12   : > { %181 = vadd.xlane.f32.xlu0 %v180_v8  ;;  %v2113_v23 = vadd.s32 40, %v2069_v1  ;;  %v249_v25 = vadd.s32 32, %v2069_v1  ;;  %v2119_v26 = vadd.s32 56, %v2069_v1  ;;  %v2123_v27 = vadd.s32 48, %v2069_v1 }
  0x13   : > { %vm686_vm8 = vcmask 1041409   ;;  %vm688_vm9 = vcmask 1042434   ;;  %vm690_vm10 = vcmask 1043459   ;;  %vm693_vm11 = vcmask 519168  }
  0x14   : > { %vm1605_vm12 = vcmask 1044484   ;;  %vm1607_vm13 = vcmask 1045509   ;;  %vm1609_vm14 = vcmask 1046534   ;;  %vm1611_vm15 = vcmask 1047559  }
  0x18   : > { %196 = vadd.xlane.f32.xlu2 %v195_v13  ;;  %190 = vadd.xlane.f32.xlu1 %v189_v14 }
  0x1a   : > { %184 = vadd.xlane.f32.xlu0 %v183_v15 }
  0x20   : > { %202 = vadd.xlane.f32.xlu1 %v201_v18 }
  0x22   : > { %199 = vadd.xlane.f32.xlu0 %v198_v19 }
  0x30   : > { %227 = vperm.xlu2 %1948, %v222_v21  }
  0x36   : > { %233 = vperm.xlu0 %1949, %v222_v21  }
  0x38   : > { %1951 = vset.pattern.permute.xlu2 %v2108_v22 }
  0x39   : > { %239 = vperm.xlu1 %1950, %v222_v21  }
  0x3e   : > { %1956 = vset.pattern.permute.xlu0 %v2069_v1 }
  0x40   : > { %245 = vperm.xlu2 %1951, %v222_v21  }
  0x41   : > { %1953 = vset.pattern.permute.xlu1 %v2113_v23 }
  0x46   : > { %276 = vperm.xlu0 %1956, %v271_v24  }
  0x48   : > { %1952 = vset.pattern.permute.xlu2 %v249_v25 }
  0x49   : > { %257 = vperm.xlu1 %1953, %v222_v21  }
  0x4e   : > { %1961 = vset.pattern.permute.xlu0 %v2113_v23 }
  0x50   : > { %251 = vperm.xlu2 %1952, %v222_v21  }
  0x51   : > { %1955 = vset.pattern.permute.xlu1 %v2119_v26 }
  0x56   : > { %306 = vperm.xlu0 %1961, %v271_v24  }
  0x58   : > { %1954 = vset.pattern.permute.xlu2 %v2123_v27 }
  0x59   : > { %269 = vperm.xlu1 %1955, %v222_v21  }
  0x5e   : > { %1966 = vset.pattern.permute.xlu0 %v2091_v9 }
  0x60   : > { %263 = vperm.xlu2 %1954, %v222_v21  }
  0x61   : > { %1958 = vset.pattern.permute.xlu1 %v2091_v9 }
  0x66   : > { %337 = vperm.xlu0 %1966, %v320_v28  }
  0x68   : > { %1957 = vset.pattern.permute.xlu2 %v2074_v2 }
  0x69   : > { %288 = vperm.xlu1 %1958, %v271_v24  }
  0x6e   : > { %1971 = vset.pattern.permute.xlu0 %v2119_v26 }
  0x70   : > { %282 = vperm.xlu2 %1957, %v271_v24  }
  0x71   : > { %1960 = vset.pattern.permute.xlu1 %v249_v25 }
  0x76   : > { %367 = vperm.xlu0 %1971, %v320_v28  }
  0x78   : > { %1959 = vset.pattern.permute.xlu2 %v2108_v22 }
  0x79   : > { %300 = vperm.xlu1 %1960, %v271_v24  }
  0x7e   : > { %1976 = vset.pattern.permute.xlu0 %v249_v25 }
  0x80   : > { %294 = vperm.xlu2 %1959, %v271_v24  }
  0x81   : > { %1963 = vset.pattern.permute.xlu1 %v2119_v26 }
  0x83   : > { %v194_v31 = vpop.xlane.xlu2 %193  ;;  %v188_v41 = vpop.xlane.xlu1 %187 }
  0x84   : > { %v2164_v54 = vmul.f32 0.0625, %v194_v31 }
  0x85   : > { %v182_v30 = vpop.xlane.xlu0 %181 }
  0x86   : > { %398 = vperm.xlu0 %1976, %v2132_v29   ;;  %v204_v56 = vmul.f32 0.0625, %v182_v30 }
  0x88   : > { %1962 = vset.pattern.permute.xlu2 %v2123_v27 }
  0x89   : > { %318 = vperm.xlu1 %1963, %v271_v24  }
  0x8b   : > { %v2137_v33 = vpop.xlane.xlu2 %196  ;;  %v191_v44 = vpop.xlane.xlu1 %190 }
  0x8c   : > { %v2169_v60 = vmul.f32 0.0625, %v191_v44  ;;  %v209_v5 = vmul.f32 0.0625, %v2137_v33 }
  0x8d   : > { %v185_v32 = vpop.xlane.xlu0 %184 }
  0x8e   : > { %1981 = vset.pattern.permute.xlu0 %v2037_v36  ;;  %v2141_v37 = vmul.f32 0.0625, %v185_v32 }
  0x90   : > { %312 = vperm.xlu2 %1962, %v271_v24  }
  0x91   : > { %1965 = vset.pattern.permute.xlu1 %v2074_v2 }
  0x93   : > { %v228_v35 = vpop.permute.xlu2 %227  ;;  %v203_v47 = vpop.xlane.xlu1 %202 }
  0x94   : > { %v450_v59 = vmul.f32 %v228_v35, %v204_v56 }
  0x95   : > { %v200_v34 = vpop.xlane.xlu0 %199 }
  0x96   : > { %v2148_v43 = vmul.f32 0.0625, %v200_v34 }
  0x98   : > { %1964 = vset.pattern.permute.xlu2 %v2069_v1 }
  0x99   : > { %331 = vperm.xlu1 %1965, %v320_v28  }
  0x9b   : > { %v246_v40 = vpop.permute.xlu2 %245 }
  0x9c   : > { %v453_v61 = vmul.f32 %v246_v40, %v2169_v60 }
  0xa0   : > { %325 = vperm.xlu2 %1964, %v320_v28  }
  0xa1   : > { %1968 = vset.pattern.permute.xlu1 %v249_v25 }
  0xa8   : > { %v234_v38 = vpop.permute.xlu0 %233  ;;  %1967 = vset.pattern.permute.xlu2 %v2108_v22 }
  0xa9   : > { %v451_v39 = vmul.f32 %v234_v38, %v2141_v37  ;;  %349 = vperm.xlu1 %1968, %v320_v28  }
  0xaa   : > { %v2146_v42 = vpop.permute.xlu2 %251 }
  0xab   : > { %518 = vperm.xlu0 %1981, %v451_v39   ;;  %v240_v49 = vpop.permute.xlu1 %239  ;;  %v454_v14 = vmul.f32 %v2146_v42, %v2164_v54 }
  0xb0   : > { %343 = vperm.xlu2 %1967, %v320_v28  }
  0xb1   : > { %1970 = vset.pattern.permute.xlu1 %v2123_v27 }
  0xb8   : > { %1969 = vset.pattern.permute.xlu2 %v2113_v23  ;;  %v277_v58 = vpop.permute.xlu0 %276 }
  0xb9   : > { %361 = vperm.xlu1 %1970, %v320_v28   ;;  %v458_v12 = vmul.f32 %v277_v58, %v204_v56 }
  0xba   : > { %v264_v45 = vpop.permute.xlu2 %263 }
  0xbb   : > { %v456_v46 = vmul.f32 %v264_v45, %v2148_v43  ;;  %v258_v51 = vpop.permute.xlu1 %257 }
  0xbc   : > { %v455_v6 = vmul.f32 %v258_v51, %v209_v5 }
  0xbd   : > { %533 = vperm.xlu0 %1981, %v456_v46  }
  0xc0   : > { %355 = vperm.xlu2 %1969, %v320_v28  }
  0xc1   : > { %1973 = vset.pattern.permute.xlu1 %v2074_v2  ;;  %v2173_v2 = vmul.f32 0.0625, %v203_v47 }
  0xc8   : > { %1972 = vset.pattern.permute.xlu2 %v2069_v1  ;;  %v307_v63 = vpop.permute.xlu0 %306 }
  0xc9   : > { %380 = vperm.xlu1 %1973, %v2132_v29   ;;  %v463_v25 = vmul.f32 %v307_v63, %v209_v5 }
  0xca   : > { %v283_v48 = vpop.permute.xlu2 %282 }
  0xcb   : > { %v459_v50 = vmul.f32 %v283_v48, %v2141_v37  ;;  %v270_v52 = vpop.permute.xlu1 %269 }
  0xcc   : > { %v457_v17 = vmul.f32 %v270_v52, %v2173_v2  ;;  %v213_v52 = vld [vmem:[%s2860_s2] sm:$0xff] }
  0xcd   : > { %542 = vperm.xlu0 %1981, %v459_v50  }
  0xd0   : > { %374 = vperm.xlu2 %1972, %v2132_v29  }
  0xd1   : > { %1975 = vset.pattern.permute.xlu1 %v2108_v22 }
  0xd8   : > { %1974 = vset.pattern.permute.xlu2 %v2091_v9  ;;  %v338_v8 = vpop.permute.xlu0 %337  ;;  %v206_v9 = vmul.f32 0.0625, %v188_v41 }
  0xd9   : > { %392 = vperm.xlu1 %1975, %v2132_v29  }
  0xda   : > { %v295_v62 = vpop.permute.xlu2 %294  ;;  %v468_v10 = vmul.f32 %v338_v8, %v206_v9  ;;  %v452_v11 = vmul.f32 %v240_v49, %v206_v9 }
  0xdb   : > { %v289_v53 = vpop.permute.xlu1 %288  ;;  %v461_v15 = vmul.f32 %v295_v62, %v2169_v60 }
  0xdc   : > { %v460_v22 = vmul.f32 %v289_v53, %v206_v9  ;;  %v713_v53 = vperm.slane %v213_v52, 1 }
  0xe0   : > { %386 = vperm.xlu2 %1974, %v2132_v29  }
  0xe1   : > { %1978 = vset.pattern.permute.xlu1 %v2123_v27 }
  0xe8   : > { %1977 = vset.pattern.permute.xlu2 %v2113_v23 }
  0xe9   : > { %410 = vperm.xlu1 %1978, %v2132_v29  }
  0xea   : > { %v313_v7 = vpop.permute.xlu2 %312 }
  0xeb   : > { %v301_v55 = vpop.permute.xlu1 %300  ;;  %v464_v18 = vmul.f32 %v313_v7, %v2148_v43 }
  0xec   : > { %v462_v57 = vmul.f32 %v301_v55, %v2164_v54 }
  0xee   : > { %551 = vperm.xlu0 %1981, %v462_v57   ;;  %v727_v57 = vperm.slane %v213_v52, 3 }
  0xf0   : > { %404 = vperm.xlu2 %1977, %v2132_v29  }
  0xf1   : > { %1980 = vset.pattern.permute.xlu1 %v2037_v36 }
  0xf2   : > { %515 = vperm.xlu1 %1980, %v450_v59  }
  0xf8   : > { %1979 = vset.pattern.permute.xlu2 %v2119_v26 }
  0xfa   : > { %524 = vperm.xlu1 %1980, %v453_v61   ;;  %v326_v13 = vpop.permute.xlu2 %325 }
  0xfb   : > { %v319_v3 = vpop.permute.xlu1 %318  ;;  %v466_v30 = vmul.f32 %v326_v13, %v204_v56 }
  0xfc   : > { %v465_v4 = vmul.f32 %v319_v3, %v2173_v2  ;;  %v755_v3 = vperm.slane %v213_v52, 7 }
  0xfe   : > { %560 = vperm.xlu0 %1981, %v465_v4   ;;  %v2219_v4 = vld [vmem:[%s2860_s2 + $0x8] sm:$0xff] }
  0xff   : > { %v776_v7 = vperm.slane %v2219_v4, 2 }
 0x100   : > { %416 = vperm.xlu2 %1979, %v2132_v29   ;;  %v368_v29 = vpop.permute.xlu0 %367 }
 0x101   : > { %v473_v31 = vmul.f32 %v368_v29, %v2173_v2 }
 0x102   : > { %530 = vperm.xlu1 %1980, %v455_v6  }
 0x106   : > { %569 = vperm.xlu0 %1981, %v468_v10   ;;  %v783_v10 = vperm.slane %v2219_v4, 3 }
 0x108   : > { %1982 = vset.pattern.permute.xlu2 %v2037_v36  ;;  %v399_v45 = vpop.permute.xlu0 %398 }
 0x109   : > { %521 = vperm.xlu2 %1982, %v452_v11   ;;  %v478_v47 = vmul.f32 %v399_v45, %v2164_v54  ;;  %v790_v11 = vperm.slane %v2219_v4, 4 }
 0x10a   : > { %539 = vperm.xlu1 %1980, %v458_v12   ;;  %v344_v16 = vpop.permute.xlu2 %343 }
 0x10b   : > { %v332_v21 = vpop.permute.xlu1 %331  ;;  %v469_v32 = vmul.f32 %v344_v16, %v2169_v60  ;;  %v804_v16 = vperm.slane %v2219_v4, 6 }
 0x10c   : > { %v467_v23 = vmul.f32 %v332_v21, %v2141_v37  ;;  %v811_v21 = vperm.slane %v2219_v4, 7 }
 0x111   : > { %527 = vperm.xlu2 %1982, %v454_v14  }
 0x112   : > { %548 = vperm.xlu1 %1980, %v461_v15   ;;  %v797_v15 = vperm.slane %v2219_v4, 5 }
 0x119   : > { %536 = vperm.xlu2 %1982, %v457_v17  }
 0x11a   : > { %v356_v19 = vpop.permute.xlu2 %355  ;;  %557 = vperm.xlu1 %1980, %v464_v18  }
 0x11b   : > { %v471_v20 = vmul.f32 %v356_v19, %v209_v5  ;;  %v350_v24 = vpop.permute.xlu1 %349 }
 0x11c   : > { %v470_v26 = vmul.f32 %v350_v24, %v2164_v54  ;;  %v706_v54 = vperm.slane %v213_v52, 0 }
 0x11d   : > { %578 = vperm.xlu0 %1981, %v471_v20   ;;  %v2212_v62 = vpop.permute.xlu0 %518  ;;  %v2246_v20 = vld [vmem:[%s2860_s2 + $0x10] sm:$0xff] }
 0x11e   : > { %v853_v29 = vperm.slane %v2246_v20, 5 }
 0x121   : > { %545 = vperm.xlu2 %1982, %v460_v22   ;;  %v825_v22 = vperm.slane %v2246_v20, 1 }
 0x122   : > { %566 = vperm.xlu1 %1980, %v467_v23  }
 0x129   : > { %554 = vperm.xlu2 %1982, %v463_v25  }
 0x12a   : > { %v375_v27 = vpop.permute.xlu2 %374  ;;  %575 = vperm.xlu1 %1980, %v470_v26   ;;  %v832_v26 = vperm.slane %v2246_v20, 2 }
 0x12b   : > { %v474_v28 = vmul.f32 %v375_v27, %v204_v56  ;;  %v362_v34 = vpop.permute.xlu1 %361  ;;  %v846_v27 = vperm.slane %v2246_v20, 4 }
 0x12c   : > { %v472_v38 = vmul.f32 %v362_v34, %v2148_v43  ;;  %v2267_v34 = vld [vmem:[%s2860_s2 + $0x18] sm:$0xff] }
 0x12d   : > { %587 = vperm.xlu0 %1981, %v474_v28  }
 0x12f   : > { %v2225_v8 = vpop.permute.xlu0 %533 }
 0x131   : > { %563 = vperm.xlu2 %1982, %v466_v30  }
 0x132   : > { %584 = vperm.xlu1 %1980, %v473_v31   ;;  %v867_v31 = vperm.slane %v2246_v20, 7 }
 0x139   : > { %572 = vperm.xlu2 %1982, %v469_v32  }
 0x13a   : > { %v387_v33 = vpop.permute.xlu2 %386 }
 0x13b   : > { %v476_v35 = vmul.f32 %v387_v33, %v206_v9  ;;  %v381_v39 = vpop.permute.xlu1 %380 }
 0x13c   : > { %v475_v40 = vmul.f32 %v381_v39, %v2141_v37 }
 0x13d   : > { %593 = vperm.xlu1 %1980, %v476_v35   ;;  %v2270_v35 = vand.u32 127, %v223_v0 }
 0x13f   : > { %v543_v12 = vpop.permute.xlu0 %542  ;;  %v2274_v39 = vadd.s32 4294967288, %v2270_v35  ;;  %v2287_v0 = vadd.s32 4294967280, %v2270_v35 }
 0x141   : > { %581 = vperm.xlu2 %1982, %v472_v38   ;;  %v874_v38 = vperm.slane %v2267_v34, 0 }
 0x149   : > { %590 = vperm.xlu2 %1982, %v475_v40   ;;  %v888_v40 = vperm.slane %v2267_v34, 2 }
 0x14a   : > { %v405_v41 = vpop.permute.xlu2 %404 }
 0x14b   : > { %v479_v42 = vmul.f32 %v405_v41, %v209_v5  ;;  %v393_v44 = vpop.permute.xlu1 %392  ;;  %v762_v5 = vperm.slane %v2219_v4, 0  ;;  %v614_v41 = vperm.slane %v2212_v62, %v2274_v39  ;;  %v909_v62 = vperm.slane %v2267_v34, 5 }
 0x14c   : > { %v477_v46 = vmul.f32 %v393_v44, %v2169_v60  ;;  %v741_v60 = vperm.slane %v213_v52, 5  ;;  %v2282_v44 = vadd.s32 4294967272, %v2270_v35 }
 0x14d   : > { %602 = vperm.xlu1 %1980, %v479_v42  }
 0x14e   : > { %596 = vperm.xlu0 %1981, %v477_v46  }
 0x151   : > { %599 = vperm.xlu2 %1982, %v478_v47  }
 0x155   : > { %1985 = vset.pattern.permute.xlu1 %v2069_v1 }
 0x15a   : > { %v417_v48 = vpop.permute.xlu2 %416 }
 0x15b   : > { %v481_v49 = vmul.f32 %v417_v48, %v2173_v2  ;;  %v411_v50 = vpop.permute.xlu1 %410  ;;  %v748_v2 = vperm.slane %v213_v52, 6  ;;  %v2292_v48 = vadd.s32 4294967248, %v2270_v35 }
 0x15c   : > { %v480_v37 = vmul.f32 %v411_v50, %v2148_v43  ;;  %v720_v43 = vperm.slane %v213_v52, 2  ;;  %v642_v50 = vperm.slane %v543_v12, %v2274_v39  ;;  %v2326_v12 = vadd.s32 4294967240, %v2270_v35 }
 0x15d   : > { %608 = vperm.xlu2 %1982, %v481_v49  }
 0x15e   : > { %605 = vperm.xlu0 %1981, %v480_v37  }
 0x160   : > { %v2237_v17 = vpop.permute.xlu0 %551 }
 0x163   : > { %v2195_v51 = vpop.permute.xlu2 %521 }
 0x164   : > { %v2202_v55 = vpop.permute.xlu1 %515 }
 0x165   : > { %1984 = vset.pattern.permute.xlu2 %v2069_v1  ;;  %v612_v42 = vperm.slane %v2202_v55, %v2270_v35  ;;  %v618_v55 = vperm.slane %v2195_v51, %v2287_v0 }
 0x166   : > { %1983 = vset.pattern.permute.xlu0 %v2069_v1  ;;  %v734_v1 = vperm.slane %v213_v52, 4 }
 0x167   : > { %v616_v52 = vsel %vm615_vm1, %v614_v41, %v612_v42 }
 0x168   : > { %v620_v51 = vsel %vm619_vm2, %v618_v55, %v616_v52 }
 0x16b   : > { %v2204_v56 = vpop.permute.xlu2 %527 }
 0x16c   : > { %v2206_v58 = vpop.permute.xlu1 %524 }
 0x16d   : > { %718 = vperm.xlu2 %1984, %v713_v53   ;;  %v622_v53 = vperm.slane %v2206_v58, %v2282_v44 }
 0x16e   : > { %711 = vperm.xlu0 %1983, %v706_v54   ;;  %v2302_v54 = vadd.s32 4294967256, %v2270_v35 }
 0x170   : > { %v2250_v23 = vpop.permute.xlu0 %560 }
 0x173   : > { %v2208_v59 = vpop.permute.xlu2 %536 }
 0x174   : > { %v2210_v61 = vpop.permute.xlu1 %530  ;;  %v638_v55 = vperm.slane %v2208_v59, %v2326_v12 }
 0x175   : > { %725 = vperm.xlu2 %1984, %v720_v43  }
 0x176   : > { %732 = vperm.xlu0 %1983, %v727_v57   ;;  %v895_v57 = vperm.slane %v2267_v34, 3 }
 0x178   : > { %v570_v28 = vpop.permute.xlu0 %569 }
 0x17b   : > { %v2214_v63 = vpop.permute.xlu2 %545 }
 0x17c   : > { %v2222_v6 = vpop.permute.xlu1 %539 }
 0x17d   : > { %739 = vperm.xlu2 %1984, %v734_v1   ;;  %v641_v49 = vperm.slane %v2222_v6, %v2270_v35  ;;  %v634_v1 = vperm.slane %v2225_v8, %v2292_v48  ;;  %v624_v6 = vsel %vm623_vm3, %v622_v53, %v620_v51  ;;  %v659_v8 = vperm.slane %v570_v28, %v2287_v0 }
 0x17e   : > { %746 = vperm.xlu0 %1983, %v741_v60   ;;  %v654_v53 = vperm.slane %v2250_v23, %v2326_v12 }
 0x17f   : > { %v643_v60 = vsel %vm615_vm1, %v642_v50, %v641_v49 }
 0x183   : > { %v2227_v9 = vpop.permute.xlu2 %554 }
 0x184   : > { %v2231_v13 = vpop.permute.xlu1 %548 }
 0x185   : > { %753 = vperm.xlu2 %1984, %v748_v2   ;;  %v646_v58 = vperm.slane %v2231_v13, %v2282_v44  ;;  %v625_v2 = vadd.s32 4294967264, %v2270_v35 }
 0x186   : > { %760 = vperm.xlu0 %1983, %v755_v3   ;;  %v644_v3 = vperm.slane %v2214_v63, %v2287_v0 }
 0x188   : > { %v645_v13 = vsel %vm619_vm2, %v644_v3, %v643_v60 }
 0x18b   : > { %v2233_v14 = vpop.permute.xlu2 %563 }
 0x18c   : > { %v2239_v18 = vpop.permute.xlu1 %557  ;;  %v656_v43 = vperm.slane %v2233_v14, %v2270_v35 }
 0x18d   : > { %767 = vperm.xlu2 %1984, %v762_v5  }
 0x18e   : > { %781 = vperm.xlu0 %1983, %v776_v7   ;;  %v630_v7 = vperm.slane %v2210_v61, %v2302_v54 }
 0x18f   : > { %v2262_v33 = vpop.permute.xlu0 %578 }
 0x190   : > { %v665_v42 = vperm.slane %v2262_v33, %v2302_v54 }
 0x193   : > { %v2241_v19 = vpop.permute.xlu2 %572 }
 0x194   : > { %v567_v24 = vpop.permute.xlu1 %566 }
 0x195   : > { %788 = vperm.xlu2 %1984, %v783_v10   ;;  %v657_v37 = vperm.slane %v567_v24, %v2274_v39  ;;  %v661_v24 = vperm.slane %v2241_v19, %v2282_v44 }
 0x196   : > { %795 = vperm.xlu0 %1983, %v790_v11   ;;  %v626_v11 = vperm.slane %v2204_v56, %v625_v2  ;;  %v648_v56 = vperm.slane %v2237_v17, %v625_v2 }
 0x197   : > { %v658_v5 = vsel %vm615_vm1, %v657_v37, %v656_v43 }
 0x19b   : > { %v2252_v25 = vpop.permute.xlu2 %581 }
 0x19c   : > { %v2257_v30 = vpop.permute.xlu1 %575  ;;  %v667_v43 = vperm.slane %v2252_v25, %v2292_v48 }
 0x19d   : > { %802 = vperm.xlu2 %1984, %v797_v15   ;;  %v647_v15 = vsel %vm623_vm3, %v646_v58, %v645_v13  ;;  %v663_v61 = vperm.slane %v2257_v30, %v625_v2 }
 0x19e   : > { %809 = vperm.xlu0 %1983, %v804_v16   ;;  %v660_v16 = vsel %vm619_vm2, %v659_v8, %v658_v5  ;;  %v649_v17 = vsel %vm627_vm4, %v648_v56, %v647_v15 }
 0x19f   : > { %v588_v46 = vpop.permute.xlu0 %587  ;;  %v662_v19 = vsel %vm623_vm3, %v661_v24, %v660_v16 }
 0x1a3   : > { %v2260_v32 = vpop.permute.xlu2 %590 }
 0x1a4   : > { %v2284_v45 = vpop.permute.xlu1 %584 }
 0x1a5   : > { %816 = vperm.xlu2 %1984, %v811_v21   ;;  %v672_v21 = vperm.slane %v2260_v32, %v2274_v39  ;;  %v916_v32 = vperm.slane %v2267_v34, 6  ;;  %v664_v39 = vsel %vm627_vm4, %v663_v61, %v662_v19  ;;  %v669_v50 = vperm.slane %v2284_v45, %v2326_v12 }
 0x1a6   : > { %830 = vperm.xlu0 %1983, %v825_v22   ;;  %v628_v22 = vsel %vm627_vm4, %v626_v11, %v624_v6  ;;  %v666_v49 = vsel %vm631_vm5, %v665_v42, %v664_v39  ;;  %v839_v19 = vperm.slane %v2246_v20, 3  ;;  %v2439_v42 = vld [vmem:[%s2860_s2 + $0x38] sm:$0xff] }
 0x1a7   : > { %v632_v28 = vsel %vm631_vm5, %v630_v7, %v628_v22  ;;  %v769_v22 = vperm.slane %v2219_v4, 1 }
 0x1ab   : > { %v2289_v47 = vpop.permute.xlu2 %599 }
 0x1ac   : > { %v678_v37 = vperm.slane %v2289_v47, %v625_v2  ;;  %v668_v47 = vsel %vm635_vm6, %v667_v43, %v666_v49  ;;  %v1119_v49 = vperm.slane %v2439_v42, 3  ;;  %v923_v43 = vperm.slane %v2267_v34, 7 }
 0x1ad   : > { %837 = vperm.xlu2 %1984, %v832_v26   ;;  %v670_v23 = vsel %vm639_vm7, %v669_v50, %v668_v47  ;;  %v1147_v47 = vperm.slane %v2439_v42, 7 }
 0x1ae   : > { %851 = vperm.xlu0 %1983, %v846_v27   ;;  %v2342_v27 = vld [vmem:[%s2860_s2 + $0x20] sm:$0xff] }
 0x1af   : > { %v594_v10 = vpop.permute.xlu1 %593  ;;  %v930_v41 = vperm.slane %v2342_v27, 0  ;;  %v951_v51 = vperm.slane %v2342_v27, 3  ;;  %v972_v11 = vperm.slane %v2342_v27, 6 }
 0x1b0   : > { %v674_v26 = vperm.slane %v594_v10, %v2287_v0  ;;  %v958_v10 = vperm.slane %v2342_v27, 4 }
 0x1b5   : > { %858 = vperm.xlu2 %1984, %v853_v29   ;;  %v671_v29 = vperm.slane %v588_v46, %v2270_v35 }
 0x1b6   : > { %872 = vperm.xlu0 %1983, %v867_v31   ;;  %v652_v31 = vperm.slane %v2239_v18, %v2292_v48  ;;  %v636_v18 = vsel %vm635_vm6, %v634_v1, %v632_v28  ;;  %v818_v28 = vperm.slane %v2246_v20, 0 }
 0x1b7   : > { %v609_v63 = vpop.permute.xlu2 %608  ;;  %v640_v58 = vsel %vm639_vm7, %v638_v55, %v636_v18  ;;  %v1140_v55 = vperm.slane %v2439_v42, 6 }
 0x1b8   : > { %v684_v25 = vperm.slane %v609_v63, %v2326_v12  ;;  %v2399_v12 = vld [vmem:[%s2860_s2 + $0x28] sm:$0xff]  ;;  %v979_v63 = vperm.slane %v2342_v27, 7 }
 0x1b9   : > { %v993_v15 = vperm.slane %v2399_v12, 1  ;;  %v1000_v16 = vperm.slane %v2399_v12, 2  ;;  %v1014_v61 = vperm.slane %v2399_v12, 4  ;;  %v1021_v24 = vperm.slane %v2399_v12, 5 }
 0x1bd   : > { %879 = vperm.xlu2 %1984, %v874_v38   ;;  %v650_v38 = vperm.slane %v2227_v9, %v2302_v54 }
 0x1be   : > { %893 = vperm.xlu0 %1983, %v888_v40   ;;  %v673_v40 = vsel %vm615_vm1, %v672_v21, %v671_v29  ;;  %vm1670_vm1 = vcmask 31744  }
 0x1bf   : > { %v651_v0 = vsel %vm631_vm5, %v650_v38, %v649_v17  ;;  %v603_v52 = vpop.permute.xlu1 %602  ;;  %v2424_v17 = vld [vmem:[%s2860_s2 + $0x30] sm:$0xff] }
 0x1c0   : > { %v597_v14 = vpop.permute.xlu0 %596  ;;  %v653_v9 = vsel %vm635_vm6, %v652_v31, %v651_v0  ;;  %v680_v1 = vperm.slane %v603_v52, %v2302_v54  ;;  %v1042_v4 = vperm.slane %v2424_v17, 0  ;;  %v1056_v31 = vperm.slane %v2424_v17, 2 }
 0x1c1   : > { %v676_v30 = vperm.slane %v597_v14, %v2282_v44  ;;  %v675_v44 = vsel %vm619_vm2, %v674_v26, %v673_v40  ;;  %v655_v45 = vsel %vm639_vm7, %v654_v53, %v653_v9  ;;  %v1035_v26 = vperm.slane %v2399_v12, 7 }
 0x1c2   : > { %v687_v54 = vsel %vm686_vm8, %v655_v45, %v640_v58  ;;  %v1063_v39 = vperm.slane %v2424_v17, 3  ;;  %v1077_v40 = vperm.slane %v2424_v17, 5  ;;  %v1084_v18 = vperm.slane %v2424_v17, 6 }
 0x1c3   : > { %v677_v46 = vsel %vm623_vm3, %v676_v30, %v675_v44  ;;  %v689_v6 = vsel %vm688_vm9, %v670_v23, %v687_v54  ;;  %v881_v9 = vperm.slane %v2267_v34, 1  ;;  %v902_v52 = vperm.slane %v2267_v34, 4 }
 0x1c4   : > { %v1126_v53 = vperm.slane %v2439_v42, 4  ;;  %v965_v34 = vperm.slane %v2342_v27, 5 }
 0x1c5   : > { %900 = vperm.xlu2 %1984, %v895_v57   ;;  %v679_v57 = vsel %vm627_vm4, %v678_v37, %v677_v46  ;;  %v1098_v46 = vperm.slane %v2439_v42, 0 }
 0x1c6   : > { %914 = vperm.xlu0 %1983, %v909_v62   ;;  %v937_v62 = vperm.slane %v2342_v27, 1  ;;  %v681_v2 = vsel %vm631_vm5, %v680_v1, %v679_v57  ;;  %v944_v1 = vperm.slane %v2342_v27, 2 }
 0x1c7   : > { %v2368_v33 = vpop.permute.xlu2 %718 }
 0x1cd   : > { %921 = vperm.xlu2 %1984, %v916_v32  }
 0x1ce   : > { %935 = vperm.xlu0 %1983, %v930_v41   ;;  %v860_v41 = vperm.slane %v2246_v20, 6  ;;  %v1105_v20 = vperm.slane %v2439_v42, 1 }
 0x1cf   : > { %v2392_v8 = vpop.permute.xlu2 %725 }
 0x1d0   : > { %v606_v60 = vpop.permute.xlu0 %605 }
 0x1d1   : > { %v682_v59 = vperm.slane %v606_v60, %v2292_v48 }
 0x1d3   : > { %v683_v3 = vsel %vm635_vm6, %v682_v59, %v681_v2 }
 0x1d4   : > { %v685_v5 = vsel %vm639_vm7, %v684_v25, %v683_v3  ;;  %v1028_v3 = vperm.slane %v2399_v12, 6 }
 0x1d5   : > { %942 = vperm.xlu2 %1984, %v937_v62   ;;  %v691_v48 = vsel %vm690_vm10, %v685_v5, %v689_v6  ;;  %v986_v62 = vperm.slane %v2399_v12, 0 }
 0x1d6   : > { %956 = vperm.xlu0 %1983, %v951_v51   ;;  %v694_v7 = vsel %vm693_vm11, %v691_v48, 0.0  ;;  %v1007_v51 = vperm.slane %v2399_v12, 3 }
 0x1d7   : > { %695 = vadd.xlane.f32.xlu1 %v694_v7  ;;  %v2401_v13 = vpop.permute.xlu2 %739 }
 0x1dd   : > { %963 = vperm.xlu2 %1984, %v958_v10   ;;  %v1049_v10 = vperm.slane %v2424_v17, 1 }
 0x1de   : > { %977 = vperm.xlu0 %1983, %v972_v11  }
 0x1df   : > { %v2409_v21 = vpop.permute.xlu2 %753 }
 0x1e0   : > { %v2404_v14 = vpop.permute.xlu0 %711 }
 0x1e5   : > { %984 = vperm.xlu2 %1984, %v979_v63  }
 0x1e6   : > { %998 = vperm.xlu0 %1983, %v993_v15   ;;  %v1070_v15 = vperm.slane %v2424_v17, 4 }
 0x1e7   : > { %v2417_v29 = vpop.permute.xlu2 %767 }
 0x1e8   : > { %v2411_v56 = vpop.permute.xlu0 %732 }
 0x1ed   : > { %1005 = vperm.xlu2 %1984, %v1000_v16  }
 0x1ee   : > { %1019 = vperm.xlu0 %1983, %v1014_v61  }
 0x1ef   : > { %v2429_v32 = vpop.permute.xlu2 %788 }
 0x1f0   : > { %774 = vperm.xlu1 %1985, %v769_v22   ;;  %v2419_v30 = vpop.permute.xlu0 %746  ;;  %v1091_v22 = vperm.slane %v2424_v17, 7 }
 0x1f5   : > { %1026 = vperm.xlu2 %1984, %v1021_v24  }
 0x1f6   : > { %1040 = vperm.xlu0 %1983, %v1035_v26  }
 0x1f7   : > { %v2441_v44 = vpop.permute.xlu2 %802 }
 0x1f8   : > { %823 = vperm.xlu1 %1985, %v818_v28   ;;  %v2431_v38 = vpop.permute.xlu0 %760 }
 0x1fd   : > { %1047 = vperm.xlu2 %1984, %v1042_v4   ;;  %v1112_v4 = vperm.slane %v2439_v42, 2 }
 0x1fe   : > { %1061 = vperm.xlu0 %1983, %v1056_v31  }
 0x1ff   : > { %v2450_v50 = vpop.permute.xlu2 %816 }
 0x200   : > { %844 = vperm.xlu1 %1985, %v839_v19   ;;  %v2444_v0 = vpop.permute.xlu0 %781 }
 0x205   : > { %1068 = vperm.xlu2 %1984, %v1063_v39   ;;  %v1133_v39 = vperm.slane %v2439_v42, 5 }
 0x206   : > { %1082 = vperm.xlu0 %1983, %v1077_v40  }
 0x207   : > { %v2458_v57 = vpop.permute.xlu2 %837 }
 0x208   : > { %865 = vperm.xlu1 %1985, %v860_v41   ;;  %v2452_v37 = vpop.permute.xlu0 %795 }
 0x20d   : > { %1089 = vperm.xlu2 %1984, %v1084_v18  }
 0x20e   : > { %1103 = vperm.xlu0 %1983, %v1098_v46  }
 0x20f   : > { %v2465_v60 = vpop.permute.xlu2 %858 }
 0x210   : > { %886 = vperm.xlu1 %1985, %v881_v9   ;;  %v2460_v45 = vpop.permute.xlu0 %809 }
 0x215   : > { %1110 = vperm.xlu2 %1984, %v1105_v20  }
 0x216   : > { %1124 = vperm.xlu0 %1983, %v1119_v49  }
 0x217   : > { %v2471_v23 = vpop.permute.xlu2 %879 }
 0x218   : > { %907 = vperm.xlu1 %1985, %v902_v52   ;;  %v2467_v58 = vpop.permute.xlu0 %830 }
 0x21d   : > { %1131 = vperm.xlu2 %1984, %v1126_v53  }
 0x21e   : > { %1145 = vperm.xlu0 %1983, %v1140_v55  }
 0x21f   : > { %v2476_v25 = vpop.permute.xlu2 %900 }
 0x220   : > { %928 = vperm.xlu1 %1985, %v923_v43   ;;  %v2473_v59 = vpop.permute.xlu0 %851 }
 0x225   : > { %1152 = vperm.xlu2 %1984, %v1147_v47  }
 0x226   : > { %1987 = vset.pattern.permute.xlu0 %v2037_v36 }
 0x227   : > { %v2482_v27 = vpop.permute.xlu2 %921 }
 0x228   : > { %949 = vperm.xlu1 %1985, %v944_v1   ;;  %v2478_v2 = vpop.permute.xlu0 %872 }
 0x22d   : > { %1988 = vset.pattern.permute.xlu2 %v2037_v36 }
 0x22f   : > { %v2493_v11 = vpop.permute.xlu2 %942 }
 0x230   : > { %970 = vperm.xlu1 %1985, %v965_v34   ;;  %v2484_v54 = vpop.permute.xlu0 %893 }
 0x238   : > { %991 = vperm.xlu1 %1985, %v986_v62   ;;  %v2495_v12 = vpop.permute.xlu0 %914 }
 0x240   : > { %1012 = vperm.xlu1 %1985, %v1007_v51   ;;  %v2504_v16 = vpop.permute.xlu0 %935 }
 0x248   : > { %1033 = vperm.xlu1 %1985, %v1028_v3  }
 0x24a   : > { %v696_v5 = vpop.xlane.xlu1 %695 }
 0x24b   : > { %v2486_v6 = vmax.f32 %v696_v5, 0.0 }
 0x24d   : > { %v1219_v48 = vmul.f32 %v2368_v33, %v2486_v6  ;;  %v1220_v7 = vmul.f32 %v2392_v8, %v2486_v6  ;;  %v1222_v63 = vmul.f32 %v2401_v13, %v2486_v6  ;;  %v1224_v33 = vmul.f32 %v2409_v21, %v2486_v6  ;;  %v2502_v8 = vpop.permute.xlu2 %963  ;;  %v2512_v21 = vpop.permute.xlu0 %956 }
 0x24e   : > { %v1225_v61 = vmul.f32 %v2431_v38, %v2486_v6  ;;  %v1228_v28 = vmul.f32 %v2444_v0, %v2486_v6  ;;  %v1230_v17 = vmul.f32 %v2452_v37, %v2486_v6  ;;  %v1231_v38 = vmul.f32 %v2441_v44, %v2486_v6 }
 0x24f   : > { %1353 = vperm.xlu2 %1988, %v1220_v7   ;;  %1350 = vperm.xlu0 %1987, %v1219_v48   ;;  %v1233_v18 = vmul.f32 %v2450_v50, %v2486_v6  ;;  %v1218_v44 = vmul.f32 %v2404_v14, %v2486_v6  ;;  %v1236_v20 = vmul.f32 %v2458_v57, %v2486_v6 }
 0x250   : > { %1054 = vperm.xlu1 %1985, %v1049_v10   ;;  %v1221_v50 = vmul.f32 %v2411_v56, %v2486_v6  ;;  %v1223_v55 = vmul.f32 %v2419_v30, %v2486_v6  ;;  %v1242_v56 = vmul.f32 %v2471_v23, %v2486_v6  ;;  %v1245_v30 = vmul.f32 %v2476_v25, %v2486_v6 }
 0x251   : > { %v1229_v3 = vmul.f32 %v2429_v32, %v2486_v6  ;;  %v1232_v7 = vmul.f32 %v2460_v45, %v2486_v6  ;;  %v1251_v32 = vmul.f32 %v2493_v11, %v2486_v6  ;;  %v1238_v11 = vmul.f32 %v2473_v59, %v2486_v6 }
 0x255   : > { %v2509_v24 = vpop.permute.xlu2 %984  ;;  %v2524_v40 = vpop.permute.xlu0 %977 }
 0x257   : > { %1359 = vperm.xlu2 %1988, %v1222_v63   ;;  %1365 = vperm.xlu0 %1987, %v1224_v33  }
 0x258   : > { %1075 = vperm.xlu1 %1985, %v1070_v15  }
 0x25d   : > { %v2519_v19 = vpop.permute.xlu2 %1005  ;;  %v2533_v9 = vpop.permute.xlu0 %998 }
 0x25e   : > { %v1260_v59 = vmul.f32 %v2519_v19, %v2486_v6 }
 0x25f   : > { %1368 = vperm.xlu2 %1988, %v1225_v61  }
 0x260   : > { %1096 = vperm.xlu1 %1985, %v1091_v22   ;;  %v1254_v22 = vmul.f32 %v2502_v8, %v2486_v6  ;;  %v1241_v8 = vmul.f32 %v2478_v2, %v2486_v6 }
 0x262   : > { %v775_v13 = vpop.permute.xlu1 %774 }
 0x263   : > { %v1227_v26 = vmul.f32 %v775_v13, %v2486_v6 }
 0x265   : > { %1374 = vperm.xlu0 %1987, %v1227_v26   ;;  %v2529_v46 = vpop.permute.xlu2 %1026  ;;  %v2543_v52 = vpop.permute.xlu0 %1019 }
 0x267   : > { %1377 = vperm.xlu2 %1988, %v1228_v28  }
 0x268   : > { %1117 = vperm.xlu1 %1985, %v1112_v4  }
 0x26a   : > { %v824_v31 = vpop.permute.xlu1 %823 }
 0x26b   : > { %v1234_v0 = vmul.f32 %v824_v31, %v2486_v6 }
 0x26d   : > { %1383 = vperm.xlu0 %1987, %v1230_v17   ;;  %v2541_v37 = vpop.permute.xlu2 %1047  ;;  %v2554_v47 = vpop.permute.xlu0 %1040 }
 0x26f   : > { %1386 = vperm.xlu2 %1988, %v1231_v38  }
 0x270   : > { %1138 = vperm.xlu1 %1985, %v1133_v39  }
 0x272   : > { %v845_v41 = vpop.permute.xlu1 %844 }
 0x273   : > { %v1237_v49 = vmul.f32 %v845_v41, %v2486_v6  ;;  %v1244_v41 = vmul.f32 %v2484_v54, %v2486_v6  ;;  %v1266_v54 = vmul.f32 %v2541_v37, %v2486_v6 }
 0x275   : > { %1392 = vperm.xlu0 %1987, %v1233_v18   ;;  %v2552_v57 = vpop.permute.xlu2 %1068  ;;  %v2564_v51 = vpop.permute.xlu0 %1061  ;;  %v1263_v18 = vmul.f32 %v2529_v46, %v2486_v6 }
 0x276   : > { %v1268_v37 = vmul.f32 %v2564_v51, %v2486_v6  ;;  %v1259_v51 = vmul.f32 %v2533_v9, %v2486_v6 }
 0x277   : > { %1395 = vperm.xlu2 %1988, %v1234_v0  }
 0x278   : > { %1986 = vset.pattern.permute.xlu1 %v2037_v36  ;;  %v1239_v36 = vmul.f32 %v2465_v60, %v2486_v6  ;;  %v1226_v60 = vmul.f32 %v2417_v29, %v2486_v6  ;;  %v1248_v29 = vmul.f32 %v2482_v27, %v2486_v6  ;;  %v1235_v27 = vmul.f32 %v2467_v58, %v2486_v6 }
 0x279   : > { %1347 = vperm.xlu1 %1986, %v1218_v44   ;;  %v1257_v58 = vmul.f32 %v2509_v24, %v2486_v6 }
 0x27a   : > { %v866_v42 = vpop.permute.xlu1 %865 }
 0x27b   : > { %v1240_v53 = vmul.f32 %v866_v42, %v2486_v6  ;;  %v1247_v42 = vmul.f32 %v2495_v12, %v2486_v6 }
 0x27d   : > { %1401 = vperm.xlu0 %1987, %v1236_v20   ;;  %v2561_v62 = vpop.permute.xlu2 %1089  ;;  %v2573_v10 = vpop.permute.xlu0 %1082 }
 0x27f   : > { %1404 = vperm.xlu2 %1988, %v1237_v49  }
 0x281   : > { %1356 = vperm.xlu1 %1986, %v1221_v50   ;;  %v1250_v50 = vmul.f32 %v2504_v16, %v2486_v6  ;;  %v1269_v16 = vmul.f32 %v2552_v57, %v2486_v6  ;;  %v1271_v57 = vmul.f32 %v2573_v10, %v2486_v6 }
 0x282   : > { %v887_v14 = vpop.permute.xlu1 %886 }
 0x283   : > { %v1243_v1 = vmul.f32 %v887_v14, %v2486_v6 }
 0x285   : > { %1410 = vperm.xlu0 %1987, %v1239_v36   ;;  %v1111_v25 = vpop.permute.xlu2 %1110  ;;  %v2582_v61 = vpop.permute.xlu0 %1103 }
 0x286   : > { %v1275_v12 = vmul.f32 %v1111_v25, %v2486_v6  ;;  %v1262_v25 = vmul.f32 %v2543_v52, %v2486_v6 }
 0x287   : > { %1413 = vperm.xlu2 %1988, %v1240_v53   ;;  %v1253_v53 = vmul.f32 %v2512_v21, %v2486_v6 }
 0x289   : > { %1362 = vperm.xlu1 %1986, %v1223_v55  }
 0x28a   : > { %v908_v43 = vpop.permute.xlu1 %907 }
 0x28b   : > { %v1246_v23 = vmul.f32 %v908_v43, %v2486_v6 }
 0x28d   : > { %1419 = vperm.xlu0 %1987, %v1242_v56   ;;  %v2580_v33 = vpop.permute.xlu2 %1131  ;;  %v1125_v4 = vpop.permute.xlu0 %1124 }
 0x28e   : > { %v1278_v21 = vmul.f32 %v2580_v33, %v2486_v6 }
 0x28f   : > { %1422 = vperm.xlu2 %1988, %v1243_v1   ;;  %v1277_v1 = vmul.f32 %v1125_v4, %v2486_v6 }
 0x291   : > { %1371 = vperm.xlu1 %1986, %v1226_v60   ;;  %v1256_v60 = vmul.f32 %v2524_v40, %v2486_v6  ;;  %v1272_v40 = vmul.f32 %v2561_v62, %v2486_v6 }
 0x292   : > { %v929_v34 = vpop.permute.xlu1 %928 }
 0x293   : > { %v1249_v48 = vmul.f32 %v929_v34, %v2486_v6 }
 0x295   : > { %1428 = vperm.xlu0 %1987, %v1245_v30   ;;  %v2591_v28 = vpop.permute.xlu2 %1152  ;;  %v1146_v24 = vpop.permute.xlu0 %1145 }
 0x296   : > { %v1281_v9 = vmul.f32 %v2591_v28, %v2486_v6 }
 0x297   : > { %1431 = vperm.xlu2 %1988, %v1246_v23  }
 0x299   : > { %1380 = vperm.xlu1 %1986, %v1229_v3  }
 0x29a   : > { %v950_v5 = vpop.permute.xlu1 %949 }
 0x29b   : > { %v1252_v15 = vmul.f32 %v950_v5, %v2486_v6 }
 0x29d   : > { %1437 = vperm.xlu0 %1987, %v1248_v29   ;;  %v1280_v29 = vmul.f32 %v1146_v24, %v2486_v6 }
 0x29f   : > { %1440 = vperm.xlu2 %1988, %v1249_v48  }
 0x2a1   : > { %1389 = vperm.xlu1 %1986, %v1232_v7  }
 0x2a2   : > { %v971_v63 = vpop.permute.xlu1 %970 }
 0x2a3   : > { %v1255_v13 = vmul.f32 %v971_v63, %v2486_v6  ;;  %v1265_v63 = vmul.f32 %v2554_v47, %v2486_v6 }
 0x2a5   : > { %1446 = vperm.xlu0 %1987, %v1251_v32  }
 0x2a7   : > { %1449 = vperm.xlu2 %1988, %v1252_v15   ;;  %v1274_v15 = vmul.f32 %v2582_v61, %v2486_v6 }
 0x2a9   : > { %1398 = vperm.xlu1 %1986, %v1235_v27   ;;  %v2598_v38 = vpop.permute.xlu2 %1353 }
 0x2aa   : > { %v992_v45 = vpop.permute.xlu1 %991 }
 0x2ab   : > { %v1258_v31 = vmul.f32 %v992_v45, %v2486_v6 }
 0x2ad   : > { %1455 = vperm.xlu0 %1987, %v1254_v22  }
 0x2af   : > { %1458 = vperm.xlu2 %1988, %v1255_v13  }
 0x2b1   : > { %1407 = vperm.xlu1 %1986, %v1238_v11   ;;  %v2605_v0 = vpop.permute.xlu2 %1359 }
 0x2b2   : > { %v1013_v26 = vpop.permute.xlu1 %1012  ;;  %v1542_v24 = vperm.slane %v2605_v0, %v2270_v35 }
 0x2b3   : > { %v1261_v39 = vmul.f32 %v1013_v26, %v2486_v6 }
 0x2b5   : > { %1464 = vperm.xlu0 %1987, %v1257_v58   ;;  %v1540_v58 = vperm.slane %v2598_v38, %v2270_v35 }
 0x2b7   : > { %1467 = vperm.xlu2 %1988, %v1258_v31  }
 0x2b9   : > { %1416 = vperm.xlu1 %1986, %v1241_v8   ;;  %v2617_v49 = vpop.permute.xlu2 %1368 }
 0x2ba   : > { %v1034_v17 = vpop.permute.xlu1 %1033 }
 0x2bb   : > { %v1264_v44 = vmul.f32 %v1034_v17, %v2486_v6 }
 0x2bd   : > { %1473 = vperm.xlu0 %1987, %v1260_v59  }
 0x2bf   : > { %1476 = vperm.xlu2 %1988, %v1261_v39  }
 0x2c1   : > { %1425 = vperm.xlu1 %1986, %v1244_v41   ;;  %v2608_v19 = vpop.permute.xlu0 %1350  ;;  %v1378_v43 = vpop.permute.xlu2 %1377 }
 0x2c2   : > { %v1055_v2 = vpop.permute.xlu1 %1054  ;;  %v1539_v45 = vperm.slane %v2608_v19, %v2270_v35  ;;  %v1548_v11 = vperm.slane %v1378_v43, %v2270_v35 }
 0x2c3   : > { %v1267_v46 = vmul.f32 %v1055_v2, %v2486_v6 }
 0x2c5   : > { %1482 = vperm.xlu0 %1987, %v1263_v18  }
 0x2c7   : > { %1485 = vperm.xlu2 %1988, %v1264_v44  }
 0x2c9   : > { %1434 = vperm.xlu1 %1986, %v1247_v42   ;;  %v2621_v14 = vpop.permute.xlu0 %1365  ;;  %v2639_v30 = vpop.permute.xlu2 %1386 }
 0x2ca   : > { %v2614_v20 = vpop.permute.xlu1 %1075  ;;  %v1551_v42 = vperm.slane %v2639_v30, %v2270_v35 }
 0x2cd   : > { %1491 = vperm.xlu0 %1987, %v1266_v54   ;;  %v1544_v54 = vperm.slane %v2621_v14, %v2270_v35 }
 0x2cf   : > { %1494 = vperm.xlu2 %1988, %v1267_v46   ;;  %v1270_v46 = vmul.f32 %v2614_v20, %v2486_v6 }
 0x2d1   : > { %1443 = vperm.xlu1 %1986, %v1250_v50   ;;  %v2652_v48 = vpop.permute.xlu2 %1395 }
 0x2d2   : > { %v2624_v36 = vpop.permute.xlu1 %1096 }
 0x2d3   : > { %v1273_v30 = vmul.f32 %v2624_v36, %v2486_v6 }
 0x2d5   : > { %1518 = vperm.xlu0 %1987, %v1275_v12  }
 0x2d7   : > { %1497 = vperm.xlu2 %1988, %v1268_v37   ;;  %v1375_v55 = vpop.permute.xlu0 %1374 }
 0x2d8   : > { %v1547_v13 = vperm.slane %v1375_v55, %v2270_v35 }
 0x2d9   : > { %1452 = vperm.xlu1 %1986, %v1253_v53   ;;  %v2660_v62 = vpop.permute.xlu2 %1404  ;;  %v1545_v53 = vperm.slane %v2617_v49, %v2270_v35  ;;  %v1554_v49 = vperm.slane %v2652_v48, %v2270_v35 }
 0x2da   : > { %v1118_v56 = vpop.permute.xlu1 %1117 }
 0x2db   : > { %v1276_v4 = vmul.f32 %v1118_v56, %v2486_v6 }
 0x2dd   : > { %1500 = vperm.xlu0 %1987, %v1269_v16  }
 0x2df   : > { %1524 = vperm.xlu2 %1988, %v1277_v1   ;;  %v2635_v34 = vpop.permute.xlu0 %1383 }
 0x2e0   : > { %v1550_v44 = vperm.slane %v2635_v34, %v2270_v35 }
 0x2e1   : > { %1461 = vperm.xlu1 %1986, %v1256_v60   ;;  %v2668_v52 = vpop.permute.xlu2 %1413 }
 0x2e2   : > { %v2641_v23 = vpop.permute.xlu1 %1138 }
 0x2e3   : > { %v1279_v56 = vmul.f32 %v2641_v23, %v2486_v6 }
 0x2e5   : > { %1527 = vperm.xlu0 %1987, %v1278_v21  }
 0x2e7   : > { %1506 = vperm.xlu2 %1988, %v1271_v57   ;;  %v2649_v3 = vpop.permute.xlu0 %1392 }
 0x2e9   : > { %1470 = vperm.xlu1 %1986, %v1259_v51   ;;  %v1423_v38 = vpop.permute.xlu2 %1422 }
 0x2eb   : > { %v1348_v5 = vpop.permute.xlu1 %1347 }
 0x2ec   : > { %v1538_v33 = vperm.slane %v1348_v5, %v2270_v35  ;;  %v1557_v5 = vperm.slane %v2660_v62, %v2270_v35 }
 0x2ed   : > { %1509 = vperm.xlu0 %1987, %v1272_v40  }
 0x2ee   : > { %v1602_v26 = vsel %vm686_vm8, %v1539_v45, %v1538_v33 }
 0x2ef   : > { %1533 = vperm.xlu2 %1988, %v1280_v29   ;;  %v2658_v10 = vpop.permute.xlu0 %1401  ;;  %v1603_v8 = vsel %vm688_vm9, %v1540_v58, %v1602_v26 }
 0x2f0   : > { %v1556_v51 = vperm.slane %v2658_v10, %v2270_v35  ;;  %v1560_v10 = vperm.slane %v2668_v52, %v2270_v35 }
 0x2f1   : > { %1479 = vperm.xlu1 %1986, %v1262_v25   ;;  %v1432_v16 = vpop.permute.xlu2 %1431 }
 0x2f3   : > { %v1357_v7 = vpop.permute.xlu1 %1356 }
 0x2f4   : > { %v1541_v61 = vperm.slane %v1357_v7, %v2270_v35 }
 0x2f5   : > { %1536 = vperm.xlu0 %1987, %v1281_v9  }
 0x2f6   : > { %v1604_v17 = vsel %vm690_vm10, %v1541_v61, %v1603_v8 }
 0x2f7   : > { %v2666_v27 = vpop.permute.xlu0 %1410  ;;  %v1606_v18 = vsel %vm1605_vm12, %v1542_v24, %v1604_v17 }
 0x2f8   : > { %v1559_v6 = vperm.slane %v2666_v27, %v2270_v35 }
 0x2f9   : > { %1488 = vperm.xlu1 %1986, %v1265_v63   ;;  %v1441_v21 = vpop.permute.xlu2 %1440 }
 0x2fa   : > { %v1569_v24 = vperm.slane %v1441_v21, %v2270_v35 }
 0x2fb   : > { %v1363_v32 = vpop.permute.xlu1 %1362 }
 0x2fc   : > { %v1543_v59 = vperm.slane %v1363_v32, %v2270_v35 }
 0x2fe   : > { %v1608_v19 = vsel %vm1607_vm13, %v1543_v59, %v1606_v18 }
 0x2ff   : > { %v2686_v39 = vpop.permute.xlu0 %1419  ;;  %v1610_v12 = vsel %vm1609_vm14, %v1544_v54, %v1608_v19  ;;  %v1553_v54 = vperm.slane %v2649_v3, %v2270_v35 }
 0x300   : > { %v1612_v14 = vsel %vm1611_vm15, %v1545_v53, %v1610_v12  ;;  %v1562_v27 = vperm.slane %v2686_v39, %v2270_v35 }
 0x301   : > { %1515 = vperm.xlu1 %1986, %v1274_v15   ;;  %v1671_v20 = vsel %vm1670_vm1, %v1612_v14, 0.0  ;;  %v1450_v36 = vpop.permute.xlu2 %1449 }
 0x303   : > { %v1372_v22 = vpop.permute.xlu1 %1371 }
 0x304   : > { %v1546_v47 = vperm.slane %v1372_v22, %v2270_v35 }
 0x306   : > { %v1613_v28 = vsel %vm686_vm8, %v1547_v13, %v1546_v47  ;;  %v1563_v47 = vperm.slane %v1423_v38, %v2270_v35 }
 0x307   : > { %v1614_v31 = vsel %vm688_vm9, %v1548_v11, %v1613_v28  ;;  %v1429_v55 = vpop.permute.xlu0 %1428  ;;  %v1566_v28 = vperm.slane %v1432_v16, %v2270_v35  ;;  %v1572_v16 = vperm.slane %v1450_v36, %v2270_v35 }
 0x308   : > { %v1627_v11 = vsel %vm686_vm8, %v1563_v47, %v1562_v27  ;;  %v1565_v61 = vperm.slane %v1429_v55, %v2270_v35 }
 0x309   : > { %1521 = vperm.xlu1 %1986, %v1276_v4   ;;  %v1459_v22 = vpop.permute.xlu2 %1458 }
 0x30b   : > { %v1381_v41 = vpop.permute.xlu1 %1380 }
 0x30c   : > { %v1549_v2 = vperm.slane %v1381_v41, %v2270_v35 }
 0x30e   : > { %v1615_v0 = vsel %vm690_vm10, %v1549_v2, %v1614_v31 }
 0x30f   : > { %v1616_v50 = vsel %vm1605_vm12, %v1550_v44, %v1615_v0  ;;  %v1438_v34 = vpop.permute.xlu0 %1437 }
 0x310   : > { %v2705_v37 = vsel %vm1607_vm13, %v1551_v42, %v1616_v50  ;;  %v1568_v59 = vperm.slane %v1438_v34, %v2270_v35 }
 0x311   : > { %1503 = vperm.xlu1 %1986, %v1270_v46   ;;  %v1468_v8 = vpop.permute.xlu2 %1467 }
 0x313   : > { %v1390_v43 = vpop.permute.xlu1 %1389 }
 0x314   : > { %v1552_v18 = vperm.slane %v1390_v43, %v2270_v35 }
 0x316   : > { %v1618_v42 = vsel %vm1609_vm14, %v1552_v18, %v2705_v37 }
 0x317   : > { %v1447_v25 = vpop.permute.xlu0 %1446  ;;  %v1619_v12 = vsel %vm1611_vm15, %v1553_v54, %v1618_v42 }
 0x318   : > { %1672 = vadd.xlane.f32.xlu2 %v1671_v20  ;;  %v1571_v53 = vperm.slane %v1447_v25, %v2270_v35  ;;  %v1674_v55 = vsel %vm1670_vm1, %v1619_v12, 0.0 }
 0x319   : > { %1530 = vperm.xlu1 %1986, %v1279_v56   ;;  %v1477_v46 = vpop.permute.xlu2 %1476 }
 0x31b   : > { %v1399_v1 = vpop.permute.xlu1 %1398 }
 0x31c   : > { %v1555_v60 = vperm.slane %v1399_v1, %v2270_v35 }
 0x31e   : > { %v1620_v57 = vsel %vm686_vm8, %v1555_v60, %v1554_v49  ;;  %v1575_v49 = vperm.slane %v1459_v22, %v2270_v35 }
 0x31f   : > { %v1621_v23 = vsel %vm688_vm9, %v1556_v51, %v1620_v57  ;;  %v1456_v45 = vpop.permute.xlu0 %1455 }
 0x320   : > { %v1622_v48 = vsel %vm690_vm10, %v1557_v5, %v1621_v23  ;;  %v1574_v1 = vperm.slane %v1456_v45, %v2270_v35 }
 0x321   : > { %1512 = vperm.xlu1 %1986, %v1273_v30   ;;  %v1486_v60 = vpop.permute.xlu2 %1485 }
 0x322   : > { %v1584_v47 = vperm.slane %v1486_v60, %v2270_v35 }
 0x323   : > { %v1408_v40 = vpop.permute.xlu1 %1407 }
 0x324   : > { %v1558_v29 = vperm.slane %v1408_v40, %v2270_v35 }
 0x326   : > { %v1623_v9 = vsel %vm1605_vm12, %v1558_v29, %v1622_v48 }
 0x327   : > { %v1624_v7 = vsel %vm1607_vm13, %v1559_v6, %v1623_v9  ;;  %v1465_v4 = vpop.permute.xlu0 %1464  ;;  %v1578_v6 = vperm.slane %v1468_v8, %v2270_v35 }
 0x328   : > { %v1625_v62 = vsel %vm1609_vm14, %v1560_v10, %v1624_v7  ;;  %v1577_v57 = vperm.slane %v1465_v4, %v2270_v35 }
 0x329   : > { %v1495_v48 = vpop.permute.xlu2 %1494 }
 0x32b   : > { %v1417_v63 = vpop.permute.xlu1 %1416 }
 0x32c   : > { %v1561_v32 = vperm.slane %v1417_v63, %v2270_v35 }
 0x32e   : > { %v1626_v15 = vsel %vm1611_vm15, %v1561_v32, %v1625_v62  ;;  %v1581_v62 = vperm.slane %v1477_v46, %v2270_v35 }
 0x32f   : > { %v1677_v33 = vsel %vm1670_vm1, %v1626_v15, 0.0  ;;  %v1474_v0 = vpop.permute.xlu0 %1473 }
 0x330   : > { %1678 = vadd.xlane.f32.xlu0 %v1677_v33  ;;  %v1580_v7 = vperm.slane %v1474_v0, %v2270_v35  ;;  %v1587_v0 = vperm.slane %v1495_v48, %v2270_v35 }
 0x331   : > { %v1498_v15 = vpop.permute.xlu2 %1497 }
 0x333   : > { %v1426_v13 = vpop.permute.xlu1 %1425 }
 0x334   : > { %v1564_v52 = vperm.slane %v1426_v13, %v2270_v35 }
 0x336   : > { %v1628_v26 = vsel %vm688_vm9, %v1564_v52, %v1627_v11 }
 0x337   : > { %v1629_v58 = vsel %vm690_vm10, %v1565_v61, %v1628_v26  ;;  %v1483_v20 = vpop.permute.xlu0 %1482 }
 0x338   : > { %v1630_v39 = vsel %vm1605_vm12, %v1566_v28, %v1629_v58  ;;  %v1583_v22 = vperm.slane %v1483_v20, %v2270_v35 }
 0x339   : > { %v1525_v58 = vpop.permute.xlu2 %1524 }
 0x33a   : > { %v1597_v54 = vperm.slane %v1525_v58, %v2270_v35 }
 0x33b   : > { %v1435_v31 = vpop.permute.xlu1 %1434 }
 0x33c   : > { %v1567_v17 = vperm.slane %v1435_v31, %v2270_v35 }
 0x33e   : > { %v1631_v38 = vsel %vm1607_vm13, %v1567_v17, %v1630_v39 }
 0x33f   : > { %v1632_v41 = vsel %vm1609_vm14, %v1568_v59, %v1631_v38  ;;  %v1492_v29 = vpop.permute.xlu0 %1491 }
 0x340   : > { %v1633_v2 = vsel %vm1611_vm15, %v1569_v24, %v1632_v41 }
 0x341   : > { %v1680_v44 = vsel %vm1670_vm1, %v1633_v2, 0.0  ;;  %v1507_v17 = vpop.permute.xlu2 %1506 }
 0x342   : > { %1681 = vadd.xlane.f32.xlu2 %v1680_v44 }
 0x343   : > { %v1444_v19 = vpop.permute.xlu1 %1443 }
 0x344   : > { %v1570_v50 = vperm.slane %v1444_v19, %v2270_v35  ;;  %v1586_v19 = vperm.slane %v1492_v29, %v2270_v35 }
 0x346   : > { %v1634_v43 = vsel %vm686_vm8, %v1571_v53, %v1570_v50  ;;  %v1648_v12 = vsel %vm686_vm8, %v1587_v0, %v1586_v19  ;;  %v2022_v0 = vld [vmem:[%s2081_s17 + $0x10] sm:$0xff] }
 0x347   : > { %v1635_v3 = vsel %vm688_vm9, %v1572_v16, %v1634_v43  ;;  %v1519_v10 = vpop.permute.xlu0 %1518 }
 0x348   : > { %v1595_v2 = vperm.slane %v1519_v10, %v2270_v35 }
 0x349   : > { %v1534_v24 = vpop.permute.xlu2 %1533 }
 0x34b   : > { %v1453_v14 = vpop.permute.xlu1 %1452  ;;  %1675 = vadd.xlane.f32.xlu1 %v1674_v55 }
 0x34c   : > { %v1573_v37 = vperm.slane %v1453_v14, %v2270_v35 }
 0x34e   : > { %v1636_v56 = vsel %vm690_vm10, %v1573_v37, %v1635_v3  ;;  %v1588_v37 = vperm.slane %v1498_v15, %v2270_v35 }
 0x34f   : > { %v1637_v34 = vsel %vm1605_vm12, %v1574_v1, %v1636_v56  ;;  %v1501_v26 = vpop.permute.xlu0 %1500  ;;  %v1600_v56 = vperm.slane %v1534_v24, %v2270_v35 }
 0x350   : > { %v1638_v51 = vsel %vm1607_vm13, %v1575_v49, %v1637_v34  ;;  %v1589_v53 = vperm.slane %v1501_v26, %v2270_v35  ;;  %v1649_v60 = vsel %vm688_vm9, %v1588_v37, %v1648_v12 }
 0x353   : > { %v1462_v21 = vpop.permute.xlu1 %1461 }
 0x354   : > { %v1576_v30 = vperm.slane %v1462_v21, %v2270_v35  ;;  %v1650_v21 = vsel %vm690_vm10, %v1589_v53, %v1649_v60 }
 0x356   : > { %v1639_v23 = vsel %vm1609_vm14, %v1576_v30, %v1638_v51 }
 0x357   : > { %v1640_v40 = vsel %vm1611_vm15, %v1577_v57, %v1639_v23  ;;  %v1528_v8 = vpop.permute.xlu0 %1527  ;;  %v1591_v23 = vperm.slane %v1507_v17, %v2270_v35 }
 0x358   : > { %v1683_v5 = vsel %vm1670_vm1, %v1640_v40, 0.0  ;;  %v1598_v55 = vperm.slane %v1528_v8, %v2270_v35 }
 0x359   : > { %1684 = vadd.xlane.f32.xlu1 %v1683_v5 }
 0x35b   : > { %v1471_v25 = vpop.permute.xlu1 %1470 }
 0x35c   : > { %v1579_v9 = vperm.slane %v1471_v25, %v2270_v35 }
 0x35e   : > { %v1641_v36 = vsel %vm686_vm8, %v1579_v9, %v1578_v6 }
 0x35f   : > { %v1642_v63 = vsel %vm688_vm9, %v1580_v7, %v1641_v36  ;;  %v1510_v39 = vpop.permute.xlu0 %1509 }
 0x360   : > { %v1643_v45 = vsel %vm690_vm10, %v1581_v62, %v1642_v63  ;;  %v1592_v25 = vperm.slane %v1510_v39, %v2270_v35 }
 0x363   : > { %v1480_v32 = vpop.permute.xlu1 %1479 }
 0x364   : > { %v1582_v33 = vperm.slane %v1480_v32, %v2270_v35 }
 0x366   : > { %v1644_v27 = vsel %vm1605_vm12, %v1582_v33, %v1643_v45 }
 0x367   : > { %v1645_v13 = vsel %vm1607_vm13, %v1583_v22, %v1644_v27  ;;  %v1537_v43 = vpop.permute.xlu0 %1536 }
 0x368   : > { %v1646_v61 = vsel %vm1609_vm14, %v1584_v47, %v1645_v13  ;;  %v1601_v34 = vperm.slane %v1537_v43, %v2270_v35 }
 0x36b   : > { %v1489_v52 = vpop.permute.xlu1 %1488 }
 0x36c   : > { %v1585_v11 = vperm.slane %v1489_v52, %v2270_v35 }
 0x36e   : > { %v1647_v28 = vsel %vm1611_vm15, %v1585_v11, %v1646_v61  ;;  %v2021_v11 = vld [vmem:[%s2081_s17] sm:$0xff] }
 0x36f   : > { %v1686_v4 = vsel %vm1670_vm1, %v1647_v28, 0.0 }
 0x370   : > { %1687 = vadd.xlane.f32.xlu2 %v1686_v4 }
 0x373   : > { %v1516_v31 = vpop.permute.xlu1 %1515 }
 0x374   : > { %v1594_v38 = vperm.slane %v1516_v31, %v2270_v35 }
 0x376   : > { %v1655_v44 = vsel %vm686_vm8, %v1595_v2, %v1594_v38 }
 0x37b   : > { %v1522_v59 = vpop.permute.xlu1 %1521 }
 0x37c   : > { %v1596_v41 = vperm.slane %v1522_v59, %v2270_v35 }
 0x37e   : > { %v1656_v42 = vsel %vm688_vm9, %v1596_v41, %v1655_v44 }
 0x37f   : > { %v1657_v46 = vsel %vm690_vm10, %v1597_v54, %v1656_v42 }
 0x380   : > { %v1658_v1 = vsel %vm1605_vm12, %v1598_v55, %v1657_v46 }
 0x383   : > { %v1504_v18 = vpop.permute.xlu1 %1503 }
 0x384   : > { %v1590_v3 = vperm.slane %v1504_v18, %v2270_v35 }
 0x386   : > { %v1651_v57 = vsel %vm1605_vm12, %v1590_v3, %v1650_v21  ;;  %v2023_v21 = vld [vmem:[%s2081_s17 + $0x18] sm:$0xff] }
 0x387   : > { %v1652_v48 = vsel %vm1607_vm13, %v1591_v23, %v1651_v57 }
 0x388   : > { %v1653_v36 = vsel %vm1609_vm14, %v1592_v25, %v1652_v48 }
 0x38b   : > { %v1673_v50 = vpop.xlane.xlu2 %1672  ;;  %v1531_v14 = vpop.permute.xlu1 %1530 }
 0x38c   : > { %v1927_v16 = vmul.f32 -1.442695, %v1673_v50  ;;  %v1599_v20 = vperm.slane %v1531_v14, %v2270_v35 }
 0x38e   : > { %1989 = vpow2.f32 %v1927_v16  ;;  %v1659_v49 = vsel %vm1607_vm13, %v1599_v20, %v1658_v1 }
 0x38f   : > { %v1660_v30 = vsel %vm1609_vm14, %v1600_v56, %v1659_v49 }
 0x390   : > { %v1661_v51 = vsel %vm1611_vm15, %v1601_v34, %v1660_v30 }
 0x391   : > { %v1692_v40 = vsel %vm1670_vm1, %v1661_v51, 0.0 }
 0x392   : > { %1693 = vadd.xlane.f32.xlu1 %v1692_v40 }
 0x393   : > { %v1513_v29 = vpop.permute.xlu1 %1512 }
 0x394   : > { %v1990_v5 = vpop.eup %1989  ;;  %v1593_v6 = vperm.slane %v1513_v29, %v2270_v35 }
 0x395   : > { %v1719_v9 = vadd.f32 1.0, %v1990_v5 }
 0x396   : > { %v1654_v7 = vsel %vm1611_vm15, %v1593_v6, %v1653_v36 }
 0x397   : > { %1991 = vrcp.f32 %v1719_v9  ;;  %v1689_v10 = vsel %vm1670_vm1, %v1654_v7, 0.0  ;;  %v1738_v15 = vand.u32 2147483648, %v1719_v9  ;;  %v1736_v45 = vand.u32 2147483647, %v1719_v9  ;;  %v2024_v7 = vld [vmem:[%s2081_s17 + $0x8] sm:$0xff] }
 0x398   : > { %1690 = vadd.xlane.f32.xlu0 %v1689_v10  ;;  %vm1732_vm3 = vweird.f32 %v1719_v9 }
 0x399   : > { %v1739_v22 = vor.u32 1.1754944e-38, %v1738_v15  ;;  %vm1737_vm5 = vcmp.eq.f32.partialorder %v1736_v45, 8.507059e+37 }
 0x39d   : > { %v1992_v63 = vpop.eup %1991 }
 0x39e   : > { %v1728_v32 = vmul.f32 %v1992_v63, %v1719_v9  ;;  %vm1733_vm2 = vweird.f32 %v1992_v63 }
 0x39f   : > { %vm1734_vm4 = vmor %vm1732_vm3, %vm1733_vm2 }
 0x3a0   : > { %v1729_v62 = vsub.f32 1.0, %v1728_v32 }
 0x3a2   : > { %v1730_v33 = vmul.f32 %v1992_v63, %v1729_v62 }
 0x3a3   : > { %v1679_v35 = vpop.xlane.xlu0 %1678 }
 0x3a4   : > { %v1731_v27 = vadd.f32 %v1992_v63, %v1730_v33  ;;  %v1929_v13 = vmul.f32 -1.442695, %v1679_v35 }
 0x3a6   : > { %v1735_v47 = vsel %vm1734_vm4, %v1992_v63, %v1731_v27  ;;  %1993 = vpow2.f32 %v1929_v13 }
 0x3a7   : > { %v1740_v52 = vsel %vm1737_vm5, %v1739_v22, %v1735_v47 }
 0x3a8   : > { %v1847_v26 = vmul.f32 %v2021_v11, %v1740_v52  ;;  %v2025_v11 = vld [vmem:[%s2081_s17 + $0x20] sm:$0xff] }
 0x3aa   : > { %1855 = vst.msk [vmem:[%s2829_s11] sm:$0xff] %vm179_vm0, %v1847_v26 }
 0x3ac   : > { %v1994_v61 = vpop.eup %1993 }
 0x3ad   : > { %v1721_v58 = vadd.f32 1.0, %v1994_v61 }
 0x3af   : > { %1995 = vrcp.f32 %v1721_v58  ;;  %v1768_v59 = vand.u32 2147483648, %v1721_v58  ;;  %v1766_v24 = vand.u32 2147483647, %v1721_v58  ;;  %vm1762_vm7 = vweird.f32 %v1721_v58 }
 0x3b1   : > { %v1769_v41 = vor.u32 1.1754944e-38, %v1768_v59  ;;  %vm1767_vm9 = vcmp.eq.f32.partialorder %v1766_v24, 8.507059e+37 }
 0x3b5   : > { %v1996_v28 = vpop.eup %1995  ;;  %v1682_v4 = vpop.xlane.xlu2 %1681 }
 0x3b6   : > { %v1758_v31 = vmul.f32 %v1996_v28, %v1721_v58  ;;  %v1930_v8 = vmul.f32 -1.442695, %v1682_v4  ;;  %vm1763_vm6 = vweird.f32 %v1996_v28 }
 0x3b7   : > { %vm1764_vm8 = vmor %vm1762_vm7, %vm1763_vm6 }
 0x3b8   : > { %v1759_v17 = vsub.f32 1.0, %v1758_v31  ;;  %1997 = vpow2.f32 %v1930_v8 }
 0x3ba   : > { %v1760_v39 = vmul.f32 %v1996_v28, %v1759_v17 }
 0x3bc   : > { %v1761_v38 = vadd.f32 %v1996_v28, %v1760_v39 }
 0x3be   : > { %v1998_v18 = vpop.eup %1997  ;;  %v1765_v2 = vsel %vm1764_vm8, %v1996_v28, %v1761_v38  ;;  %v1676_v44 = vpop.xlane.xlu1 %1675 }
 0x3bf   : > { %v1770_v19 = vsel %vm1767_vm9, %v1769_v41, %v1765_v2  ;;  %v1722_v42 = vadd.f32 1.0, %v1998_v18  ;;  %v1928_v54 = vmul.f32 -1.442695, %v1676_v44  ;;  %v2026_v18 = vld [vmem:[%s2081_s17 + $0x28] sm:$0xff] }
 0x3c0   : > { %v1849_v46 = vmul.f32 %v2022_v0, %v1770_v19 }
 0x3c1   : > { %1999 = vrcp.f32 %v1722_v42  ;;  %v1783_v14 = vand.u32 2147483648, %v1722_v42  ;;  %v1781_v37 = vand.u32 2147483647, %v1722_v42  ;;  %vm1777_vm11 = vweird.f32 %v1722_v42 }
 0x3c2   : > { %1857 = vst.msk [vmem:[%s2829_s11 + $0x10] sm:$0xff] %vm179_vm0, %v1849_v46  ;;  %2001 = vpow2.f32 %v1928_v54 }
 0x3c3   : > { %v1784_v1 = vor.u32 1.1754944e-38, %v1783_v14  ;;  %vm1782_vm13 = vcmp.eq.f32.partialorder %v1781_v37, 8.507059e+37 }
 0x3c7   : > { %v2000_v50 = vpop.eup %1999 }
 0x3c8   : > { %v2002_v12 = vpop.eup %2001  ;;  %v1773_v53 = vmul.f32 %v2000_v50, %v1722_v42  ;;  %vm1778_vm10 = vweird.f32 %v2000_v50 }
 0x3c9   : > { %v1720_v55 = vadd.f32 1.0, %v2002_v12  ;;  %vm1779_vm12 = vmor %vm1777_vm11, %vm1778_vm10 }
 0x3ca   : > { %v1774_v43 = vsub.f32 1.0, %v1773_v53 }
 0x3cb   : > { %2003 = vrcp.f32 %v1720_v55  ;;  %v1753_v40 = vand.u32 2147483648, %v1720_v55  ;;  %v1751_v29 = vand.u32 2147483647, %v1720_v55  ;;  %vm1747_vm15 = vweird.f32 %v1720_v55 }
 0x3cc   : > { %v1775_v16 = vmul.f32 %v2000_v50, %v1774_v43  ;;  %v1685_v3 = vpop.xlane.xlu1 %1684 }
 0x3cd   : > { %v1931_v20 = vmul.f32 -1.442695, %v1685_v3  ;;  %v1754_v9 = vor.u32 1.1754944e-38, %v1753_v40  ;;  %vm1752_vm2 = vcmp.eq.f32.partialorder %v1751_v29, 8.507059e+37 }
 0x3ce   : > { %v1776_v56 = vadd.f32 %v2000_v50, %v1775_v16 }
 0x3cf   : > { %2005 = vpow2.f32 %v1931_v20 }
 0x3d0   : > { %v1780_v60 = vsel %vm1779_vm12, %v2000_v50, %v1776_v56 }
 0x3d1   : > { %v2004_v34 = vpop.eup %2003  ;;  %v1785_v49 = vsel %vm1782_vm13, %v1784_v1, %v1780_v60 }
 0x3d2   : > { %v1850_v30 = vmul.f32 %v2023_v21, %v1785_v49  ;;  %v1743_v57 = vmul.f32 %v2004_v34, %v1720_v55  ;;  %vm1748_vm14 = vweird.f32 %v2004_v34  ;;  %v2027_v21 = vld [vmem:[%s2081_s17 + $0x38] sm:$0xff] }
 0x3d3   : > { %vm1749_vm1 = vmor %vm1747_vm15, %vm1748_vm14 }
 0x3d4   : > { %1858 = vst.msk [vmem:[%s2829_s11 + $0x18] sm:$0xff] %vm179_vm0, %v1850_v30  ;;  %v1744_v51 = vsub.f32 1.0, %v1743_v57 }
 0x3d5   : > { %v2006_v23 = vpop.eup %2005 }
 0x3d6   : > { %v1745_v5 = vmul.f32 %v2004_v34, %v1744_v51  ;;  %v1723_v48 = vadd.f32 1.0, %v2006_v23 }
 0x3d8   : > { %v1746_v25 = vadd.f32 %v2004_v34, %v1745_v5  ;;  %2007 = vrcp.f32 %v1723_v48  ;;  %v1798_v15 = vand.u32 2147483648, %v1723_v48  ;;  %v1796_v45 = vand.u32 2147483647, %v1723_v48 }
 0x3d9   : > { %vm1792_vm4 = vweird.f32 %v1723_v48 }
 0x3da   : > { %v1750_v6 = vsel %vm1749_vm1, %v2004_v34, %v1746_v25  ;;  %v1799_v13 = vor.u32 1.1754944e-38, %v1798_v15  ;;  %vm1797_vm6 = vcmp.eq.f32.partialorder %v1796_v45, 8.507059e+37  ;;  %v2028_v25 = vld [vmem:[%s2081_s17 + $0x30] sm:$0xff] }
 0x3db   : > { %v1755_v36 = vsel %vm1752_vm2, %v1754_v9, %v1750_v6 }
 0x3dc   : > { %v1848_v10 = vmul.f32 %v2024_v7, %v1755_v36 }
 0x3de   : > { %v2008_v63 = vpop.eup %2007  ;;  %1856 = vst.msk [vmem:[%s2829_s11 + $0x8] sm:$0xff] %vm179_vm0, %v1848_v10 }
 0x3df   : > { %v1788_v32 = vmul.f32 %v2008_v63, %v1723_v48  ;;  %vm1793_vm3 = vweird.f32 %v2008_v63 }
 0x3e0   : > { %vm1794_vm5 = vmor %vm1792_vm4, %vm1793_vm3 }
 0x3e1   : > { %v1789_v62 = vsub.f32 1.0, %v1788_v32 }
 0x3e3   : > { %v1790_v33 = vmul.f32 %v2008_v63, %v1789_v62  ;;  %v1688_v27 = vpop.xlane.xlu2 %1687 }
 0x3e4   : > { %v1932_v35 = vmul.f32 -1.442695, %v1688_v27 }
 0x3e5   : > { %v1791_v22 = vadd.f32 %v2008_v63, %v1790_v33 }
 0x3e6   : > { %2009 = vpow2.f32 %v1932_v35 }
 0x3e7   : > { %v1795_v47 = vsel %vm1794_vm5, %v2008_v63, %v1791_v22 }
 0x3e8   : > { %v1800_v52 = vsel %vm1797_vm6, %v1799_v13, %v1795_v47 }
 0x3e9   : > { %v1851_v26 = vmul.f32 %v2025_v11, %v1800_v52 }
 0x3eb   : > { %1859 = vst.msk [vmem:[%s2829_s11 + $0x20] sm:$0xff] %vm179_vm0, %v1851_v26 }
 0x3ec   : > { %v2010_v61 = vpop.eup %2009 }
 0x3ed   : > { %v1724_v58 = vadd.f32 1.0, %v2010_v61 }
 0x3ef   : > { %2011 = vrcp.f32 %v1724_v58  ;;  %v1813_v8 = vand.u32 2147483648, %v1724_v58  ;;  %v1811_v59 = vand.u32 2147483647, %v1724_v58  ;;  %vm1807_vm8 = vweird.f32 %v1724_v58 }
 0x3f1   : > { %v1814_v24 = vor.u32 1.1754944e-38, %v1813_v8  ;;  %vm1812_vm10 = vcmp.eq.f32.partialorder %v1811_v59, 8.507059e+37 }
 0x3f5   : > { %v2012_v28 = vpop.eup %2011 }
 0x3f6   : > { %v1803_v4 = vmul.f32 %v2012_v28, %v1724_v58  ;;  %vm1808_vm7 = vweird.f32 %v2012_v28 }
 0x3f7   : > { %vm1809_vm9 = vmor %vm1807_vm8, %vm1808_vm7 }
 0x3f8   : > { %v1804_v31 = vsub.f32 1.0, %v1803_v4 }
 0x3fa   : > { %v1805_v17 = vmul.f32 %v2012_v28, %v1804_v31 }
 0x3fc   : > { %v1806_v39 = vadd.f32 %v2012_v28, %v1805_v17 }
 0x3fe   : > { %v1810_v38 = vsel %vm1809_vm9, %v2012_v28, %v1806_v39 }
 0x3ff   : > { %v1815_v41 = vsel %vm1812_vm10, %v1814_v24, %v1810_v38 }
 0x400   : > { %v1852_v2 = vmul.f32 %v2026_v18, %v1815_v41 }
 0x402   : > { %1860 = vst.msk [vmem:[%s2829_s11 + $0x28] sm:$0xff] %vm179_vm0, %v1852_v2 }
 0x405   : > { %v1694_v44 = vpop.xlane.xlu1 %1693 }
 0x406   : > { %v1934_v19 = vmul.f32 -1.442695, %v1694_v44 }
 0x408   : > { %2013 = vpow2.f32 %v1934_v19 }
 0x40b   : > { %v1691_v42 = vpop.xlane.xlu0 %1690 }
 0x40c   : > { %v1933_v54 = vmul.f32 -1.442695, %v1691_v42 }
 0x40e   : > { %v2014_v0 = vpop.eup %2013  ;;  %2015 = vpow2.f32 %v1933_v54 }
 0x40f   : > { %v1726_v46 = vadd.f32 1.0, %v2014_v0 }
 0x411   : > { %2017 = vrcp.f32 %v1726_v46  ;;  %v1843_v14 = vand.u32 2147483648, %v1726_v46  ;;  %v1841_v37 = vand.u32 2147483647, %v1726_v46  ;;  %vm1837_vm12 = vweird.f32 %v1726_v46 }
 0x413   : > { %v1844_v56 = vor.u32 1.1754944e-38, %v1843_v14  ;;  %vm1842_vm14 = vcmp.eq.f32.partialorder %v1841_v37, 8.507059e+37 }
 0x414   : > { %v2016_v50 = vpop.eup %2015 }
 0x415   : > { %v1725_v12 = vadd.f32 1.0, %v2016_v50 }
 0x417   : > { %v2018_v53 = vpop.eup %2017  ;;  %2019 = vrcp.f32 %v1725_v12  ;;  %v1828_v57 = vand.u32 2147483648, %v1725_v12  ;;  %v1826_v23 = vand.u32 2147483647, %v1725_v12  ;;  %vm1822_vm1 = vweird.f32 %v1725_v12 }
 0x418   : > { %v1833_v55 = vmul.f32 %v2018_v53, %v1726_v46  ;;  %vm1838_vm11 = vweird.f32 %v2018_v53 }
 0x419   : > { %vm1839_vm13 = vmor %vm1837_vm12, %vm1838_vm11  ;;  %v1829_v5 = vor.u32 1.1754944e-38, %v1828_v57  ;;  %vm1827_vm3 = vcmp.eq.f32.partialorder %v1826_v23, 8.507059e+37 }
 0x41a   : > { %v1834_v43 = vsub.f32 1.0, %v1833_v55 }
 0x41c   : > { %v1835_v16 = vmul.f32 %v2018_v53, %v1834_v43 }
 0x41d   : > { %v2020_v3 = vpop.eup %2019 }
 0x41e   : > { %v1836_v20 = vadd.f32 %v2018_v53, %v1835_v16  ;;  %v1818_v1 = vmul.f32 %v2020_v3, %v1725_v12  ;;  %vm1823_vm15 = vweird.f32 %v2020_v3 }
 0x41f   : > { %vm1824_vm2 = vmor %vm1822_vm1, %vm1823_vm15 }
 0x420   : > { %v1840_v60 = vsel %vm1839_vm13, %v2018_v53, %v1836_v20  ;;  %v1819_v49 = vsub.f32 1.0, %v1818_v1 }
 0x421   : > { %v1845_v34 = vsel %vm1842_vm14, %v1844_v56, %v1840_v60 }
 0x422   : > { %v1854_v30 = vmul.f32 %v2027_v21, %v1845_v34  ;;  %v1820_v51 = vmul.f32 %v2020_v3, %v1819_v49 }
 0x424   : > { %1862 = vst.msk [vmem:[%s2829_s11 + $0x38] sm:$0xff] %vm179_vm0, %v1854_v30  ;;  %v1821_v40 = vadd.f32 %v2020_v3, %v1820_v51 }
 0x426   : > { %v1825_v29 = vsel %vm1824_vm2, %v2020_v3, %v1821_v40 }
 0x427   : > { %v1830_v48 = vsel %vm1827_vm3, %v1829_v5, %v1825_v29 }
 0x428   : > { %v1853_v9 = vmul.f32 %v2028_v25, %v1830_v48 }
 0x42a   : > { %1861 = vst.msk [vmem:[%s2829_s11 + $0x30] sm:$0xff] %vm179_vm0, %v1853_v9 }
 0x42b PF: > { %s13_s12 = sadd.s32 1, %s2035_s12  }
 0x42c   : > { %p10_p4 = scmp.ge.s32.totalorder %s13_s12, 4  }
 0x42e   :  { %12 = sbr.rel (!%p10_p4) target bundleno = 1 (0x1), region = 62 }

</bundles_post_ra>
